<compile_context>
chip_gen: v6e
topology: v6e:2x2x1
jax: 0.10.0
libtpu: 0.0.40
codegen_flags: <defaults>
</compile_context>

<pallas_src>
import functools

import jax
import jax.numpy as jnp
from jax import lax
from jax.experimental import pallas as pl
from jax.experimental.pallas import tpu as pltpu


def _round_up(x, m):
    return ((x + m - 1) // m) * m


def _choose_tiling(B, T, H):
    """Pick (Bp, n_tiles): big tiles for MXU row utilization on the recurrent
    matmul, >= 2 tiles for v7x TensorCore sharding, scratch capped to fit
    comfortably inside v7x's 64 MiB VMEM."""
    budget = 32 * 1024 * 1024  # bytes for gx (f32) + h (bf16) scratch

    def scratch_bytes(bp):
        rows = T * bp
        return rows * (4 * H) * 4 + rows * H * 2

    Bp = min(128, max(8, _round_up(pl.cdiv(B, 2), 8)))
    while Bp > 8 and scratch_bytes(Bp) > budget:
        Bp -= 8
    n_tiles = max(2, pl.cdiv(B, Bp))
    return Bp, n_tiles


# ------------------------------ fused kernel ---------------------------------
def _fused_rnn_kernel(T, Bp, H, L, unroll, *refs):
    """One grid step = one batch tile of Bp sequences, all T steps, all layers.

    refs = (x_ref,
            w_ih_0, w_hh_0, b_0, ..., w_ih_{L-1}, w_hh_{L-1}, b_{L-1},
            w_out, b_out,
            out_ref,
            gx_scr, h_scr)
    """
    x_ref = refs[0]
    layer_refs = refs[1:1 + 3 * L]
    w_out_ref = refs[1 + 3 * L]          # (1, H)  f32  VMEM
    b_out_ref = refs[2 + 3 * L]          # (1,)    f32  SMEM scalar
    out_ref = refs[3 + 3 * L]            # (1, T, Bp)   f32
    gx_scr = refs[4 + 3 * L]             # (T*Bp, 4H)   f32 scratch
    h_scr = refs[5 + 3 * L]              # (T*Bp, H)    bf16 scratch

    # Per-gate pre-scale for the single-tanh trick:
    #   sigmoid(x) = 0.5 * tanh(0.5 x) + 0.5   (exact identity)
    # PyTorch gate order along 4H is [i | f | g | o]: scale 0.5 for i/f/o, 1 for g.
    col = lax.broadcasted_iota(jnp.int32, (1, 4 * H), 1)
    is_g = jnp.logical_and(col >= 2 * H, col < 3 * H)
    gate_scale = jnp.broadcast_to(
        jnp.where(is_g, jnp.float32(1.0), jnp.float32(0.5)), (Bp, 4 * H))

    # Layer-0 input: the raw x tile, time-major rows (T*Bp, I).
    cur_in = x_ref[0]

    for layer in range(L):
        w_ih = layer_refs[3 * layer][...]       # (in, 4H) bf16
        w_hh = layer_refs[3 * layer + 1][...]   # (H, 4H)  bf16
        bias = layer_refs[3 * layer + 2][...]   # (1, 4H)  f32 (b_ih + b_hh)

        # Hoisted, time-independent input projection: ONE big MXU matmul
        # instead of T tiny ones on the serialized recurrence path.
        gx_scr[...] = (
            jnp.dot(cur_in.astype(jnp.bfloat16), w_ih,
                    preferred_element_type=jnp.float32)
            + bias
        )

        def step(t, carry):
            h_prev, c_prev = carry
            row = pl.multiple_of(t * Bp, Bp)           # sublane-aligned slice
            gates = gx_scr[pl.ds(row, Bp), :] + jnp.dot(
                h_prev.astype(jnp.bfloat16), w_hh,
                preferred_element_type=jnp.float32)
            # One EUP pass over the whole (Bp, 4H) gates block.
            tg = jnp.tanh(gates * gate_scale)
            i_g = 0.5 * tg[:, 0 * H:1 * H] + 0.5       # sigmoid(i)
            f_g = 0.5 * tg[:, 1 * H:2 * H] + 0.5       # sigmoid(f)
            g_g = tg[:, 2 * H:3 * H]                   # tanh(g)
            o_g = 0.5 * tg[:, 3 * H:4 * H] + 0.5       # sigmoid(o)
            c_new = f_g * c_prev + i_g * g_g
            h_new = o_g * jnp.tanh(c_new)              # second (and last) EUP pass
            h_scr[pl.ds(row, Bp), :] = h_new.astype(jnp.bfloat16)
            return h_new, c_new

        h0 = jnp.zeros((Bp, H), jnp.float32)
        c0 = jnp.zeros((Bp, H), jnp.float32)
        lax.fori_loop(0, T, step, (h0, c0), unroll=unroll)

        cur_in = h_scr[...]                            # bf16 next-layer / head input

    # Head: relu + Linear(H -> 1) as VPU multiply + lane reduction.
    # Result laid out as (T, Bp) with Bp on lanes -> dense stores when Bp >= 128.
    y = jnp.maximum(cur_in.astype(jnp.float32), 0.0)   # (T*Bp, H)
    contrib = y * w_out_ref[...]                       # broadcast (1, H)
    out2d = jnp.sum(contrib.reshape(T, Bp, H), axis=2) + b_out_ref[0]
    out_ref[0] = out2d.astype(out_ref.dtype)


def _build_fused_call(T, B, in_size, H, L):
    Bp, n_tiles = _choose_tiling(B, T, H)
    n_rows = T * Bp
    unroll = max(1, min(T, 8))                         # bounded unroll of time loop

    kernel = functools.partial(_fused_rnn_kernel, T, Bp, H, L, unroll)

    in_specs = [pl.BlockSpec((1, n_rows, in_size), lambda b: (b, 0, 0))]
    for layer in range(L):
        lin = in_size if layer == 0 else H
        in_specs += [
            pl.BlockSpec((lin, 4 * H), lambda b: (0, 0)),
            pl.BlockSpec((H, 4 * H), lambda b: (0, 0)),
            pl.BlockSpec((1, 4 * H), lambda b: (0, 0)),
        ]
    in_specs += [
        pl.BlockSpec((1, H), lambda b: (0, 0)),
        pl.BlockSpec(memory_space=pltpu.MemorySpace.SMEM),   # b_out scalar
    ]

    call = pl.pallas_call(
        kernel,
        out_shape=jax.ShapeDtypeStruct((n_tiles, T, Bp), jnp.float32),
        grid_spec=pltpu.PrefetchScalarGridSpec(
            num_scalar_prefetch=0,
            grid=(n_tiles,),
            in_specs=in_specs,
            out_specs=pl.BlockSpec((1, T, Bp), lambda b: (b, 0, 0)),
            scratch_shapes=[
                pltpu.VMEM((n_rows, 4 * H), jnp.float32),   # hoisted gate projections
                pltpu.VMEM((n_rows, H), jnp.bfloat16),      # full hidden sequence
            ],
        ),
        compiler_params=pltpu.CompilerParams(
            # Batch tiles are independent -> shard across TensorCores (v7x);
            # the sequential time recurrence lives inside the kernel body.
            dimension_semantics=("parallel",),
            vmem_limit_bytes=64 * 1024 * 1024,
        ),
    )
    return call, n_tiles, Bp


# ------------------------------ params & wrapper ------------------------------
def init_params(key, input_size, hidden_size, num_layers):
    """PyTorch-style U(-1/sqrt(H), 1/sqrt(H)) init. Weights stored bf16 (MXU),
    biases / head in f32."""
    k = 1.0 / jnp.sqrt(jnp.float32(hidden_size))
    params = {"layers": []}
    for layer in range(num_layers):
        in_sz = input_size if layer == 0 else hidden_size
        key, k1, k2, k3, k4 = jax.random.split(key, 5)
        w_ih = jax.random.uniform(k1, (in_sz, 4 * hidden_size), jnp.float32, -k, k)
        w_hh = jax.random.uniform(k2, (hidden_size, 4 * hidden_size), jnp.float32, -k, k)
        b_ih = jax.random.uniform(k3, (1, 4 * hidden_size), jnp.float32, -k, k)
        b_hh = jax.random.uniform(k4, (1, 4 * hidden_size), jnp.float32, -k, k)
        params["layers"].append({
            "w_ih": w_ih.astype(jnp.bfloat16),
            "w_hh": w_hh.astype(jnp.bfloat16),
            "b": b_ih + b_hh,
        })
    key, k5, k6 = jax.random.split(key, 3)
    params["w_out"] = jax.random.uniform(k5, (1, hidden_size), jnp.float32, -k, k)
    params["b_out"] = jax.random.uniform(k6, (1,), jnp.float32, -k, k)
    # NOTE: out1/out2 of the PyTorch module are unused in forward -> not created.
    return params


@jax.jit
def rnn_forward(params, x_bti):
    """x_bti: (B, T, I) float32 -> (B, T) float32."""
    B, T, in_size = x_bti.shape
    H = params["layers"][0]["w_hh"].shape[0]
    L = len(params["layers"])

    call, n_tiles, Bp = _build_fused_call(T, B, in_size, H, L)
    Btot = n_tiles * Bp

    # Pack x into time-major, sublane-padded batch tiles: (n_tiles, T*Bp, I).
    # (tiny XLA reshuffle; the big intermediates never leave VMEM)
    x_tm = jnp.transpose(x_bti.astype(jnp.float32), (1, 0, 2))      # (T, B, I)
    x_tm = jnp.pad(x_tm, ((0, 0), (0, Btot - B), (0, 0)))           # (T, Btot, I)
    x_tiles = (x_tm.reshape(T, n_tiles, Bp, in_size)
                   .transpose(1, 0, 2, 3)
                   .reshape(n_tiles, T * Bp, in_size))

    args = [x_tiles]
    for lp in params["layers"]:
        args += [lp["w_ih"], lp["w_hh"], lp["b"]]
    args += [params["w_out"], params["b_out"]]

    out_tiles = call(*args)                                         # (n_tiles, T, Bp)
    out = (out_tiles.transpose(1, 0, 2)                             # (T, n_tiles, Bp)
                    .reshape(T, Btot)[:, :B])                       # (T, B)
    return out.T                                                    # (B, T) == outs.view(-1, T)


# ------------------------------ pure-JAX reference ----------------------------
def rnn_forward_ref(params, x_bti):
    B, T, _ = x_bti.shape
    seq = x_bti.astype(jnp.float32)
    for lp in params["layers"]:
        w_ih = lp["w_ih"].astype(jnp.float32)
        w_hh = lp["w_hh"].astype(jnp.float32)
        b = lp["b"]
        H = w_hh.shape[0]

        def step(carry, x_t):
            h, c = carry
            gates = x_t @ w_ih + h @ w_hh + b
            i = jax.nn.sigmoid(gates[:, 0 * H:1 * H])
            f = jax.nn.sigmoid(gates[:, 1 * H:2 * H])
            g = jnp.tanh(gates[:, 2 * H:3 * H])
            o = jax.nn.sigmoid(gates[:, 3 * H:4 * H])
            c = f * c + i * g
            h = o * jnp.tanh(c)
            return (h, c), h

        h0 = jnp.zeros((B, H), jnp.float32)
        (_, _), ys = lax.scan(step, (h0, h0), jnp.transpose(seq, (1, 0, 2)))
        seq = jnp.transpose(ys, (1, 0, 2))                          # (B, T, H)
    y = jnp.maximum(seq, 0.0)
    return jnp.einsum("bth,h->bt", y, params["w_out"][0]) + params["b_out"][0]


# ----------------------------------- main -------------------------------------
if __name__ == "__main__":
    input_size, hidden_size, num_layers = 4, 32, 2
    B, T = 2, 8

    key = jax.random.PRNGKey(0)
    pkey, xkey = jax.random.split(key)
    params = init_params(pkey, input_size, hidden_size, num_layers)
    x = jax.random.normal(xkey, (B, T, input_size), dtype=jnp.float32)

    out = rnn_forward(params, x)
    jax.block_until_ready(out)
    assert out.shape == (B, T), out.shape

    ref = rnn_forward_ref(params, x)
    max_err = float(jnp.max(jnp.abs(out - ref)))
    assert max_err < 5e-2, f"mismatch vs pure-JAX reference: {max_err}"

    print("KERNEL_OK")
</pallas_src>

<mosaic_0001>
module attributes {stable_mosaic.version = 11 : i64} {
  func.func @_fused_rnn_kernel(%arg0: i32, %arg1: memref<1x64x4xf32, #tpu.memory_space<vmem>>, %arg2: memref<4x128xbf16, #tpu.memory_space<vmem>>, %arg3: memref<32x128xbf16, #tpu.memory_space<vmem>>, %arg4: memref<1x128xf32, #tpu.memory_space<vmem>>, %arg5: memref<32x128xbf16, #tpu.memory_space<vmem>>, %arg6: memref<32x128xbf16, #tpu.memory_space<vmem>>, %arg7: memref<1x128xf32, #tpu.memory_space<vmem>>, %arg8: memref<1x32xf32, #tpu.memory_space<vmem>>, %arg9: memref<1xf32, #tpu.memory_space<smem>>, %arg10: memref<1x8x8xf32, #tpu.memory_space<vmem>>, %arg11: memref<64x128xf32, #tpu.memory_space<vmem>>, %arg12: memref<64x32xbf16, #tpu.memory_space<vmem>>) attributes {dimension_semantics = [#tpu.dimension_semantics<parallel>], iteration_bounds = array<i64: 2>, scalar_prefetch = 0 : i64, scratch_operands = 2 : i64, tpu.core_type = #tpu.core_type<tc>, window_params = [{transform_indices = @transform_0, window_bounds = array<i64: 1, 64, 4>}, {pipeline_mode = #tpu.pipeline_mode<synchronous>, transform_indices = @transform_1, window_bounds = array<i64: 4, 128>}, {pipeline_mode = #tpu.pipeline_mode<synchronous>, transform_indices = @transform_2, window_bounds = array<i64: 32, 128>}, {pipeline_mode = #tpu.pipeline_mode<synchronous>, transform_indices = @transform_3, window_bounds = array<i64: 1, 128>}, {pipeline_mode = #tpu.pipeline_mode<synchronous>, transform_indices = @transform_4, window_bounds = array<i64: 32, 128>}, {pipeline_mode = #tpu.pipeline_mode<synchronous>, transform_indices = @transform_5, window_bounds = array<i64: 32, 128>}, {pipeline_mode = #tpu.pipeline_mode<synchronous>, transform_indices = @transform_6, window_bounds = array<i64: 1, 128>}, {pipeline_mode = #tpu.pipeline_mode<synchronous>, transform_indices = @transform_7, window_bounds = array<i64: 1, 32>}, {transform_indices = @transform_8, window_bounds = array<i64: 1>}, {transform_indices = @transform_9, window_bounds = array<i64: 1, 8, 8>}]} {
    %0 = tpu.iota {dimensions = array<i32: 1>} : vector<1x128xi32>
    %c64_i32 = arith.constant 64 : i32
    %1 = vector.broadcast %c64_i32 : i32 to vector<1x128xi32>
    %2 = arith.cmpi sge, %0, %1 : vector<1x128xi32>
    %c96_i32 = arith.constant 96 : i32
    %3 = vector.broadcast %c96_i32 : i32 to vector<1x128xi32>
    %4 = arith.cmpi slt, %0, %3 : vector<1x128xi32>
    %5 = arith.andi %2, %4 : vector<1x128xi1>
    %cst = arith.constant 1.000000e+00 : f32
    %cst_0 = arith.constant 5.000000e-01 : f32
    %6 = vector.broadcast %cst : f32 to vector<1x128xf32>
    %7 = vector.broadcast %cst_0 : f32 to vector<1x128xf32>
    %8 = arith.select %5, %6, %7 : vector<1x128xi1>, vector<1x128xf32>
    %9 = vector.shape_cast %8 : vector<1x128xf32> to vector<1x128xf32>
    %10 = vector.broadcast %9 : vector<1x128xf32> to vector<8x128xf32>
    %c0 = arith.constant 0 : index
    %c0_1 = arith.constant 0 : index
    %c0_2 = arith.constant 0 : index
    %11 = vector.load %arg1[%c0, %c0_1, %c0_2] : memref<1x64x4xf32, #tpu.memory_space<vmem>>, vector<1x64x4xf32>
    %12 = vector.shape_cast %11 : vector<1x64x4xf32> to vector<64x4xf32>
    %c0_3 = arith.constant 0 : index
    %c0_4 = arith.constant 0 : index
    %13 = vector.load %arg2[%c0_3, %c0_4] : memref<4x128xbf16, #tpu.memory_space<vmem>>, vector<4x128xbf16>
    %c0_5 = arith.constant 0 : index
    %c0_6 = arith.constant 0 : index
    %14 = vector.load %arg3[%c0_5, %c0_6] : memref<32x128xbf16, #tpu.memory_space<vmem>>, vector<32x128xbf16>
    %c0_7 = arith.constant 0 : index
    %c0_8 = arith.constant 0 : index
    %15 = vector.load %arg4[%c0_7, %c0_8] : memref<1x128xf32, #tpu.memory_space<vmem>>, vector<1x128xf32>
    %16 = arith.truncf %12 : vector<64x4xf32> to vector<64x4xbf16>
    %cst_9 = arith.constant dense<0.000000e+00> : vector<64x128xf32>
    %17 = tpu.matmul %16, %13, %cst_9 {dimension_numbers = #tpu.dot_dimension_numbers<[1], [0], [0], [1], [0, 0, 1, 1], [], []>} : vector<64x4xbf16>, vector<4x128xbf16>, vector<64x128xf32> -> vector<64x128xf32>
    %18 = vector.broadcast %15 : vector<1x128xf32> to vector<64x128xf32>
    %19 = arith.addf %17, %18 : vector<64x128xf32>
    %c0_10 = arith.constant 0 : index
    %c0_11 = arith.constant 0 : index
    %20 = vector.load %arg11[%c0_10, %c0_11] : memref<64x128xf32, #tpu.memory_space<vmem>>, vector<64x128xf32>
    tpu.vector_store %arg11[%c0_10, %c0_11], %19 {strides = array<i32>} : memref<64x128xf32, #tpu.memory_space<vmem>>, vector<64x128xf32>,
    %cst_12 = arith.constant 0.000000e+00 : f32
    %21 = vector.broadcast %cst_12 : f32 to vector<8x32xf32>
    %cst_13 = arith.constant 0.000000e+00 : f32
    %22 = vector.broadcast %cst_13 : f32 to vector<8x32xf32>
    %c0_i32 = arith.constant 0 : i32
    %c8_i32 = arith.constant 8 : i32
    %23 = arith.muli %c0_i32, %c8_i32 : i32
    %24 = tpu.assume_multiple %23, 8 : i32
    %25 = arith.index_cast %24 : i32 to index
    %c0_14 = arith.constant 0 : index
    %26 = vector.load %arg11[%25, %c0_14] : memref<64x128xf32, #tpu.memory_space<vmem>>, vector<8x128xf32>
    %27 = arith.truncf %21 : vector<8x32xf32> to vector<8x32xbf16>
    %cst_15 = arith.constant dense<0.000000e+00> : vector<8x128xf32>
    %28 = tpu.matmul %27, %14, %cst_15 {dimension_numbers = #tpu.dot_dimension_numbers<[1], [0], [0], [1], [0, 0, 1, 1], [], []>} : vector<8x32xbf16>, vector<32x128xbf16>, vector<8x128xf32> -> vector<8x128xf32>
    %29 = arith.addf %26, %28 : vector<8x128xf32>
    %30 = arith.mulf %29, %10 : vector<8x128xf32>
    %31 = math.tanh %30 : vector<8x128xf32>
    %32 = vector.extract_strided_slice %31 {offsets = [0, 0], sizes = [8, 32], strides = [1, 1]} : vector<8x128xf32> to vector<8x32xf32>
    %cst_16 = arith.constant 5.000000e-01 : f32
    %33 = vector.broadcast %cst_16 : f32 to vector<8x32xf32>
    %34 = arith.mulf %33, %32 : vector<8x32xf32>
    %cst_17 = arith.constant 5.000000e-01 : f32
    %35 = vector.broadcast %cst_17 : f32 to vector<8x32xf32>
    %36 = arith.addf %34, %35 : vector<8x32xf32>
    %37 = vector.extract_strided_slice %31 {offsets = [0, 32], sizes = [8, 32], strides = [1, 1]} : vector<8x128xf32> to vector<8x32xf32>
    %cst_18 = arith.constant 5.000000e-01 : f32
    %38 = vector.broadcast %cst_18 : f32 to vector<8x32xf32>
    %39 = arith.mulf %38, %37 : vector<8x32xf32>
    %cst_19 = arith.constant 5.000000e-01 : f32
    %40 = vector.broadcast %cst_19 : f32 to vector<8x32xf32>
    %41 = arith.addf %39, %40 : vector<8x32xf32>
    %42 = vector.extract_strided_slice %31 {offsets = [0, 64], sizes = [8, 32], strides = [1, 1]} : vector<8x128xf32> to vector<8x32xf32>
    %43 = vector.extract_strided_slice %31 {offsets = [0, 96], sizes = [8, 32], strides = [1, 1]} : vector<8x128xf32> to vector<8x32xf32>
    %cst_20 = arith.constant 5.000000e-01 : f32
    %44 = vector.broadcast %cst_20 : f32 to vector<8x32xf32>
    %45 = arith.mulf %44, %43 : vector<8x32xf32>
    %cst_21 = arith.constant 5.000000e-01 : f32
    %46 = vector.broadcast %cst_21 : f32 to vector<8x32xf32>
    %47 = arith.addf %45, %46 : vector<8x32xf32>
    %48 = arith.mulf %41, %22 : vector<8x32xf32>
    %49 = arith.mulf %36, %42 : vector<8x32xf32>
    %50 = arith.addf %48, %49 : vector<8x32xf32>
    %51 = math.tanh %50 : vector<8x32xf32>
    %52 = arith.mulf %47, %51 : vector<8x32xf32>
    %53 = arith.truncf %52 : vector<8x32xf32> to vector<8x32xbf16>
    %54 = arith.index_cast %24 : i32 to index
    %c0_22 = arith.constant 0 : index
    %55 = vector.load %arg12[%54, %c0_22] : memref<64x32xbf16, #tpu.memory_space<vmem>>, vector<8x32xbf16>
    tpu.vector_store %arg12[%54, %c0_22], %53 {strides = array<i32>} : memref<64x32xbf16, #tpu.memory_space<vmem>>, vector<8x32xbf16>,
    %c1_i32 = arith.constant 1 : i32
    %c8_i32_23 = arith.constant 8 : i32
    %56 = arith.muli %c1_i32, %c8_i32_23 : i32
    %57 = tpu.assume_multiple %56, 8 : i32
    %58 = arith.index_cast %57 : i32 to index
    %c0_24 = arith.constant 0 : index
    %59 = vector.load %arg11[%58, %c0_24] : memref<64x128xf32, #tpu.memory_space<vmem>>, vector<8x128xf32>
    %60 = arith.truncf %52 : vector<8x32xf32> to vector<8x32xbf16>
    %cst_25 = arith.constant dense<0.000000e+00> : vector<8x128xf32>
    %61 = tpu.matmul %60, %14, %cst_25 {dimension_numbers = #tpu.dot_dimension_numbers<[1], [0], [0], [1], [0, 0, 1, 1], [], []>} : vector<8x32xbf16>, vector<32x128xbf16>, vector<8x128xf32> -> vector<8x128xf32>
    %62 = arith.addf %59, %61 : vector<8x128xf32>
    %63 = arith.mulf %62, %10 : vector<8x128xf32>
    %64 = math.tanh %63 : vector<8x128xf32>
    %65 = vector.extract_strided_slice %64 {offsets = [0, 0], sizes = [8, 32], strides = [1, 1]} : vector<8x128xf32> to vector<8x32xf32>
    %cst_26 = arith.constant 5.000000e-01 : f32
    %66 = vector.broadcast %cst_26 : f32 to vector<8x32xf32>
    %67 = arith.mulf %66, %65 : vector<8x32xf32>
    %cst_27 = arith.constant 5.000000e-01 : f32
    %68 = vector.broadcast %cst_27 : f32 to vector<8x32xf32>
    %69 = arith.addf %67, %68 : vector<8x32xf32>
    %70 = vector.extract_strided_slice %64 {offsets = [0, 32], sizes = [8, 32], strides = [1, 1]} : vector<8x128xf32> to vector<8x32xf32>
    %cst_28 = arith.constant 5.000000e-01 : f32
    %71 = vector.broadcast %cst_28 : f32 to vector<8x32xf32>
    %72 = arith.mulf %71, %70 : vector<8x32xf32>
    %cst_29 = arith.constant 5.000000e-01 : f32
    %73 = vector.broadcast %cst_29 : f32 to vector<8x32xf32>
    %74 = arith.addf %72, %73 : vector<8x32xf32>
    %75 = vector.extract_strided_slice %64 {offsets = [0, 64], sizes = [8, 32], strides = [1, 1]} : vector<8x128xf32> to vector<8x32xf32>
    %76 = vector.extract_strided_slice %64 {offsets = [0, 96], sizes = [8, 32], strides = [1, 1]} : vector<8x128xf32> to vector<8x32xf32>
    %cst_30 = arith.constant 5.000000e-01 : f32
    %77 = vector.broadcast %cst_30 : f32 to vector<8x32xf32>
    %78 = arith.mulf %77, %76 : vector<8x32xf32>
    %cst_31 = arith.constant 5.000000e-01 : f32
    %79 = vector.broadcast %cst_31 : f32 to vector<8x32xf32>
    %80 = arith.addf %78, %79 : vector<8x32xf32>
    %81 = arith.mulf %74, %50 : vector<8x32xf32>
    %82 = arith.mulf %69, %75 : vector<8x32xf32>
    %83 = arith.addf %81, %82 : vector<8x32xf32>
    %84 = math.tanh %83 : vector<8x32xf32>
    %85 = arith.mulf %80, %84 : vector<8x32xf32>
    %86 = arith.truncf %85 : vector<8x32xf32> to vector<8x32xbf16>
    %87 = arith.index_cast %57 : i32 to index
    %c0_32 = arith.constant 0 : index
    %88 = vector.load %arg12[%87, %c0_32] : memref<64x32xbf16, #tpu.memory_space<vmem>>, vector<8x32xbf16>
    tpu.vector_store %arg12[%87, %c0_32], %86 {strides = array<i32>} : memref<64x32xbf16, #tpu.memory_space<vmem>>, vector<8x32xbf16>,
    %c2_i32 = arith.constant 2 : i32
    %c8_i32_33 = arith.constant 8 : i32
    %89 = arith.muli %c2_i32, %c8_i32_33 : i32
    %90 = tpu.assume_multiple %89, 8 : i32
    %91 = arith.index_cast %90 : i32 to index
    %c0_34 = arith.constant 0 : index
    %92 = vector.load %arg11[%91, %c0_34] : memref<64x128xf32, #tpu.memory_space<vmem>>, vector<8x128xf32>
    %93 = arith.truncf %85 : vector<8x32xf32> to vector<8x32xbf16>
    %cst_35 = arith.constant dense<0.000000e+00> : vector<8x128xf32>
    %94 = tpu.matmul %93, %14, %cst_35 {dimension_numbers = #tpu.dot_dimension_numbers<[1], [0], [0], [1], [0, 0, 1, 1], [], []>} : vector<8x32xbf16>, vector<32x128xbf16>, vector<8x128xf32> -> vector<8x128xf32>
    %95 = arith.addf %92, %94 : vector<8x128xf32>
    %96 = arith.mulf %95, %10 : vector<8x128xf32>
    %97 = math.tanh %96 : vector<8x128xf32>
    %98 = vector.extract_strided_slice %97 {offsets = [0, 0], sizes = [8, 32], strides = [1, 1]} : vector<8x128xf32> to vector<8x32xf32>
    %cst_36 = arith.constant 5.000000e-01 : f32
    %99 = vector.broadcast %cst_36 : f32 to vector<8x32xf32>
    %100 = arith.mulf %99, %98 : vector<8x32xf32>
    %cst_37 = arith.constant 5.000000e-01 : f32
    %101 = vector.broadcast %cst_37 : f32 to vector<8x32xf32>
    %102 = arith.addf %100, %101 : vector<8x32xf32>
    %103 = vector.extract_strided_slice %97 {offsets = [0, 32], sizes = [8, 32], strides = [1, 1]} : vector<8x128xf32> to vector<8x32xf32>
    %cst_38 = arith.constant 5.000000e-01 : f32
    %104 = vector.broadcast %cst_38 : f32 to vector<8x32xf32>
    %105 = arith.mulf %104, %103 : vector<8x32xf32>
    %cst_39 = arith.constant 5.000000e-01 : f32
    %106 = vector.broadcast %cst_39 : f32 to vector<8x32xf32>
    %107 = arith.addf %105, %106 : vector<8x32xf32>
    %108 = vector.extract_strided_slice %97 {offsets = [0, 64], sizes = [8, 32], strides = [1, 1]} : vector<8x128xf32> to vector<8x32xf32>
    %109 = vector.extract_strided_slice %97 {offsets = [0, 96], sizes = [8, 32], strides = [1, 1]} : vector<8x128xf32> to vector<8x32xf32>
    %cst_40 = arith.constant 5.000000e-01 : f32
    %110 = vector.broadcast %cst_40 : f32 to vector<8x32xf32>
    %111 = arith.mulf %110, %109 : vector<8x32xf32>
    %cst_41 = arith.constant 5.000000e-01 : f32
    %112 = vector.broadcast %cst_41 : f32 to vector<8x32xf32>
    %113 = arith.addf %111, %112 : vector<8x32xf32>
    %114 = arith.mulf %107, %83 : vector<8x32xf32>
    %115 = arith.mulf %102, %108 : vector<8x32xf32>
    %116 = arith.addf %114, %115 : vector<8x32xf32>
    %117 = math.tanh %116 : vector<8x32xf32>
    %118 = arith.mulf %113, %117 : vector<8x32xf32>
    %119 = arith.truncf %118 : vector<8x32xf32> to vector<8x32xbf16>
    %120 = arith.index_cast %90 : i32 to index
    %c0_42 = arith.constant 0 : index
    %121 = vector.load %arg12[%120, %c0_42] : memref<64x32xbf16, #tpu.memory_space<vmem>>, vector<8x32xbf16>
    tpu.vector_store %arg12[%120, %c0_42], %119 {strides = array<i32>} : memref<64x32xbf16, #tpu.memory_space<vmem>>, vector<8x32xbf16>,
    %c3_i32 = arith.constant 3 : i32
    %c8_i32_43 = arith.constant 8 : i32
    %122 = arith.muli %c3_i32, %c8_i32_43 : i32
    %123 = tpu.assume_multiple %122, 8 : i32
    %124 = arith.index_cast %123 : i32 to index
    %c0_44 = arith.constant 0 : index
    %125 = vector.load %arg11[%124, %c0_44] : memref<64x128xf32, #tpu.memory_space<vmem>>, vector<8x128xf32>
    %126 = arith.truncf %118 : vector<8x32xf32> to vector<8x32xbf16>
    %cst_45 = arith.constant dense<0.000000e+00> : vector<8x128xf32>
    %127 = tpu.matmul %126, %14, %cst_45 {dimension_numbers = #tpu.dot_dimension_numbers<[1], [0], [0], [1], [0, 0, 1, 1], [], []>} : vector<8x32xbf16>, vector<32x128xbf16>, vector<8x128xf32> -> vector<8x128xf32>
    %128 = arith.addf %125, %127 : vector<8x128xf32>
    %129 = arith.mulf %128, %10 : vector<8x128xf32>
    %130 = math.tanh %129 : vector<8x128xf32>
    %131 = vector.extract_strided_slice %130 {offsets = [0, 0], sizes = [8, 32], strides = [1, 1]} : vector<8x128xf32> to vector<8x32xf32>
    %cst_46 = arith.constant 5.000000e-01 : f32
    %132 = vector.broadcast %cst_46 : f32 to vector<8x32xf32>
    %133 = arith.mulf %132, %131 : vector<8x32xf32>
    %cst_47 = arith.constant 5.000000e-01 : f32
    %134 = vector.broadcast %cst_47 : f32 to vector<8x32xf32>
    %135 = arith.addf %133, %134 : vector<8x32xf32>
    %136 = vector.extract_strided_slice %130 {offsets = [0, 32], sizes = [8, 32], strides = [1, 1]} : vector<8x128xf32> to vector<8x32xf32>
    %cst_48 = arith.constant 5.000000e-01 : f32
    %137 = vector.broadcast %cst_48 : f32 to vector<8x32xf32>
    %138 = arith.mulf %137, %136 : vector<8x32xf32>
    %cst_49 = arith.constant 5.000000e-01 : f32
    %139 = vector.broadcast %cst_49 : f32 to vector<8x32xf32>
    %140 = arith.addf %138, %139 : vector<8x32xf32>
    %141 = vector.extract_strided_slice %130 {offsets = [0, 64], sizes = [8, 32], strides = [1, 1]} : vector<8x128xf32> to vector<8x32xf32>
    %142 = vector.extract_strided_slice %130 {offsets = [0, 96], sizes = [8, 32], strides = [1, 1]} : vector<8x128xf32> to vector<8x32xf32>
    %cst_50 = arith.constant 5.000000e-01 : f32
    %143 = vector.broadcast %cst_50 : f32 to vector<8x32xf32>
    %144 = arith.mulf %143, %142 : vector<8x32xf32>
    %cst_51 = arith.constant 5.000000e-01 : f32
    %145 = vector.broadcast %cst_51 : f32 to vector<8x32xf32>
    %146 = arith.addf %144, %145 : vector<8x32xf32>
    %147 = arith.mulf %140, %116 : vector<8x32xf32>
    %148 = arith.mulf %135, %141 : vector<8x32xf32>
    %149 = arith.addf %147, %148 : vector<8x32xf32>
    %150 = math.tanh %149 : vector<8x32xf32>
    %151 = arith.mulf %146, %150 : vector<8x32xf32>
    %152 = arith.truncf %151 : vector<8x32xf32> to vector<8x32xbf16>
    %153 = arith.index_cast %123 : i32 to index
    %c0_52 = arith.constant 0 : index
    %154 = vector.load %arg12[%153, %c0_52] : memref<64x32xbf16, #tpu.memory_space<vmem>>, vector<8x32xbf16>
    tpu.vector_store %arg12[%153, %c0_52], %152 {strides = array<i32>} : memref<64x32xbf16, #tpu.memory_space<vmem>>, vector<8x32xbf16>,
    %c4_i32 = arith.constant 4 : i32
    %c8_i32_53 = arith.constant 8 : i32
    %155 = arith.muli %c4_i32, %c8_i32_53 : i32
    %156 = tpu.assume_multiple %155, 8 : i32
    %157 = arith.index_cast %156 : i32 to index
    %c0_54 = arith.constant 0 : index
    %158 = vector.load %arg11[%157, %c0_54] : memref<64x128xf32, #tpu.memory_space<vmem>>, vector<8x128xf32>
    %159 = arith.truncf %151 : vector<8x32xf32> to vector<8x32xbf16>
    %cst_55 = arith.constant dense<0.000000e+00> : vector<8x128xf32>
    %160 = tpu.matmul %159, %14, %cst_55 {dimension_numbers = #tpu.dot_dimension_numbers<[1], [0], [0], [1], [0, 0, 1, 1], [], []>} : vector<8x32xbf16>, vector<32x128xbf16>, vector<8x128xf32> -> vector<8x128xf32>
    %161 = arith.addf %158, %160 : vector<8x128xf32>
    %162 = arith.mulf %161, %10 : vector<8x128xf32>
    %163 = math.tanh %162 : vector<8x128xf32>
    %164 = vector.extract_strided_slice %163 {offsets = [0, 0], sizes = [8, 32], strides = [1, 1]} : vector<8x128xf32> to vector<8x32xf32>
    %cst_56 = arith.constant 5.000000e-01 : f32
    %165 = vector.broadcast %cst_56 : f32 to vector<8x32xf32>
    %166 = arith.mulf %165, %164 : vector<8x32xf32>
    %cst_57 = arith.constant 5.000000e-01 : f32
    %167 = vector.broadcast %cst_57 : f32 to vector<8x32xf32>
    %168 = arith.addf %166, %167 : vector<8x32xf32>
    %169 = vector.extract_strided_slice %163 {offsets = [0, 32], sizes = [8, 32], strides = [1, 1]} : vector<8x128xf32> to vector<8x32xf32>
    %cst_58 = arith.constant 5.000000e-01 : f32
    %170 = vector.broadcast %cst_58 : f32 to vector<8x32xf32>
    %171 = arith.mulf %170, %169 : vector<8x32xf32>
    %cst_59 = arith.constant 5.000000e-01 : f32
    %172 = vector.broadcast %cst_59 : f32 to vector<8x32xf32>
    %173 = arith.addf %171, %172 : vector<8x32xf32>
    %174 = vector.extract_strided_slice %163 {offsets = [0, 64], sizes = [8, 32], strides = [1, 1]} : vector<8x128xf32> to vector<8x32xf32>
    %175 = vector.extract_strided_slice %163 {offsets = [0, 96], sizes = [8, 32], strides = [1, 1]} : vector<8x128xf32> to vector<8x32xf32>
    %cst_60 = arith.constant 5.000000e-01 : f32
    %176 = vector.broadcast %cst_60 : f32 to vector<8x32xf32>
    %177 = arith.mulf %176, %175 : vector<8x32xf32>
    %cst_61 = arith.constant 5.000000e-01 : f32
    %178 = vector.broadcast %cst_61 : f32 to vector<8x32xf32>
    %179 = arith.addf %177, %178 : vector<8x32xf32>
    %180 = arith.mulf %173, %149 : vector<8x32xf32>
    %181 = arith.mulf %168, %174 : vector<8x32xf32>
    %182 = arith.addf %180, %181 : vector<8x32xf32>
    %183 = math.tanh %182 : vector<8x32xf32>
    %184 = arith.mulf %179, %183 : vector<8x32xf32>
    %185 = arith.truncf %184 : vector<8x32xf32> to vector<8x32xbf16>
    %186 = arith.index_cast %156 : i32 to index
    %c0_62 = arith.constant 0 : index
    %187 = vector.load %arg12[%186, %c0_62] : memref<64x32xbf16, #tpu.memory_space<vmem>>, vector<8x32xbf16>
    tpu.vector_store %arg12[%186, %c0_62], %185 {strides = array<i32>} : memref<64x32xbf16, #tpu.memory_space<vmem>>, vector<8x32xbf16>,
    %c5_i32 = arith.constant 5 : i32
    %c8_i32_63 = arith.constant 8 : i32
    %188 = arith.muli %c5_i32, %c8_i32_63 : i32
    %189 = tpu.assume_multiple %188, 8 : i32
    %190 = arith.index_cast %189 : i32 to index
    %c0_64 = arith.constant 0 : index
    %191 = vector.load %arg11[%190, %c0_64] : memref<64x128xf32, #tpu.memory_space<vmem>>, vector<8x128xf32>
    %192 = arith.truncf %184 : vector<8x32xf32> to vector<8x32xbf16>
    %cst_65 = arith.constant dense<0.000000e+00> : vector<8x128xf32>
    %193 = tpu.matmul %192, %14, %cst_65 {dimension_numbers = #tpu.dot_dimension_numbers<[1], [0], [0], [1], [0, 0, 1, 1], [], []>} : vector<8x32xbf16>, vector<32x128xbf16>, vector<8x128xf32> -> vector<8x128xf32>
    %194 = arith.addf %191, %193 : vector<8x128xf32>
    %195 = arith.mulf %194, %10 : vector<8x128xf32>
    %196 = math.tanh %195 : vector<8x128xf32>
    %197 = vector.extract_strided_slice %196 {offsets = [0, 0], sizes = [8, 32], strides = [1, 1]} : vector<8x128xf32> to vector<8x32xf32>
    %cst_66 = arith.constant 5.000000e-01 : f32
    %198 = vector.broadcast %cst_66 : f32 to vector<8x32xf32>
    %199 = arith.mulf %198, %197 : vector<8x32xf32>
    %cst_67 = arith.constant 5.000000e-01 : f32
    %200 = vector.broadcast %cst_67 : f32 to vector<8x32xf32>
    %201 = arith.addf %199, %200 : vector<8x32xf32>
    %202 = vector.extract_strided_slice %196 {offsets = [0, 32], sizes = [8, 32], strides = [1, 1]} : vector<8x128xf32> to vector<8x32xf32>
    %cst_68 = arith.constant 5.000000e-01 : f32
    %203 = vector.broadcast %cst_68 : f32 to vector<8x32xf32>
    %204 = arith.mulf %203, %202 : vector<8x32xf32>
    %cst_69 = arith.constant 5.000000e-01 : f32
    %205 = vector.broadcast %cst_69 : f32 to vector<8x32xf32>
    %206 = arith.addf %204, %205 : vector<8x32xf32>
    %207 = vector.extract_strided_slice %196 {offsets = [0, 64], sizes = [8, 32], strides = [1, 1]} : vector<8x128xf32> to vector<8x32xf32>
    %208 = vector.extract_strided_slice %196 {offsets = [0, 96], sizes = [8, 32], strides = [1, 1]} : vector<8x128xf32> to vector<8x32xf32>
    %cst_70 = arith.constant 5.000000e-01 : f32
    %209 = vector.broadcast %cst_70 : f32 to vector<8x32xf32>
    %210 = arith.mulf %209, %208 : vector<8x32xf32>
    %cst_71 = arith.constant 5.000000e-01 : f32
    %211 = vector.broadcast %cst_71 : f32 to vector<8x32xf32>
    %212 = arith.addf %210, %211 : vector<8x32xf32>
    %213 = arith.mulf %206, %182 : vector<8x32xf32>
    %214 = arith.mulf %201, %207 : vector<8x32xf32>
    %215 = arith.addf %213, %214 : vector<8x32xf32>
    %216 = math.tanh %215 : vector<8x32xf32>
    %217 = arith.mulf %212, %216 : vector<8x32xf32>
    %218 = arith.truncf %217 : vector<8x32xf32> to vector<8x32xbf16>
    %219 = arith.index_cast %189 : i32 to index
    %c0_72 = arith.constant 0 : index
    %220 = vector.load %arg12[%219, %c0_72] : memref<64x32xbf16, #tpu.memory_space<vmem>>, vector<8x32xbf16>
    tpu.vector_store %arg12[%219, %c0_72], %218 {strides = array<i32>} : memref<64x32xbf16, #tpu.memory_space<vmem>>, vector<8x32xbf16>,
    %c6_i32 = arith.constant 6 : i32
    %c8_i32_73 = arith.constant 8 : i32
    %221 = arith.muli %c6_i32, %c8_i32_73 : i32
    %222 = tpu.assume_multiple %221, 8 : i32
    %223 = arith.index_cast %222 : i32 to index
    %c0_74 = arith.constant 0 : index
    %224 = vector.load %arg11[%223, %c0_74] : memref<64x128xf32, #tpu.memory_space<vmem>>, vector<8x128xf32>
    %225 = arith.truncf %217 : vector<8x32xf32> to vector<8x32xbf16>
    %cst_75 = arith.constant dense<0.000000e+00> : vector<8x128xf32>
    %226 = tpu.matmul %225, %14, %cst_75 {dimension_numbers = #tpu.dot_dimension_numbers<[1], [0], [0], [1], [0, 0, 1, 1], [], []>} : vector<8x32xbf16>, vector<32x128xbf16>, vector<8x128xf32> -> vector<8x128xf32>
    %227 = arith.addf %224, %226 : vector<8x128xf32>
    %228 = arith.mulf %227, %10 : vector<8x128xf32>
    %229 = math.tanh %228 : vector<8x128xf32>
    %230 = vector.extract_strided_slice %229 {offsets = [0, 0], sizes = [8, 32], strides = [1, 1]} : vector<8x128xf32> to vector<8x32xf32>
    %cst_76 = arith.constant 5.000000e-01 : f32
    %231 = vector.broadcast %cst_76 : f32 to vector<8x32xf32>
    %232 = arith.mulf %231, %230 : vector<8x32xf32>
    %cst_77 = arith.constant 5.000000e-01 : f32
    %233 = vector.broadcast %cst_77 : f32 to vector<8x32xf32>
    %234 = arith.addf %232, %233 : vector<8x32xf32>
    %235 = vector.extract_strided_slice %229 {offsets = [0, 32], sizes = [8, 32], strides = [1, 1]} : vector<8x128xf32> to vector<8x32xf32>
    %cst_78 = arith.constant 5.000000e-01 : f32
    %236 = vector.broadcast %cst_78 : f32 to vector<8x32xf32>
    %237 = arith.mulf %236, %235 : vector<8x32xf32>
    %cst_79 = arith.constant 5.000000e-01 : f32
    %238 = vector.broadcast %cst_79 : f32 to vector<8x32xf32>
    %239 = arith.addf %237, %238 : vector<8x32xf32>
    %240 = vector.extract_strided_slice %229 {offsets = [0, 64], sizes = [8, 32], strides = [1, 1]} : vector<8x128xf32> to vector<8x32xf32>
    %241 = vector.extract_strided_slice %229 {offsets = [0, 96], sizes = [8, 32], strides = [1, 1]} : vector<8x128xf32> to vector<8x32xf32>
    %cst_80 = arith.constant 5.000000e-01 : f32
    %242 = vector.broadcast %cst_80 : f32 to vector<8x32xf32>
    %243 = arith.mulf %242, %241 : vector<8x32xf32>
    %cst_81 = arith.constant 5.000000e-01 : f32
    %244 = vector.broadcast %cst_81 : f32 to vector<8x32xf32>
    %245 = arith.addf %243, %244 : vector<8x32xf32>
    %246 = arith.mulf %239, %215 : vector<8x32xf32>
    %247 = arith.mulf %234, %240 : vector<8x32xf32>
    %248 = arith.addf %246, %247 : vector<8x32xf32>
    %249 = math.tanh %248 : vector<8x32xf32>
    %250 = arith.mulf %245, %249 : vector<8x32xf32>
    %251 = arith.truncf %250 : vector<8x32xf32> to vector<8x32xbf16>
    %252 = arith.index_cast %222 : i32 to index
    %c0_82 = arith.constant 0 : index
    %253 = vector.load %arg12[%252, %c0_82] : memref<64x32xbf16, #tpu.memory_space<vmem>>, vector<8x32xbf16>
    tpu.vector_store %arg12[%252, %c0_82], %251 {strides = array<i32>} : memref<64x32xbf16, #tpu.memory_space<vmem>>, vector<8x32xbf16>,
    %c7_i32 = arith.constant 7 : i32
    %c8_i32_83 = arith.constant 8 : i32
    %254 = arith.muli %c7_i32, %c8_i32_83 : i32
    %255 = tpu.assume_multiple %254, 8 : i32
    %256 = arith.index_cast %255 : i32 to index
    %c0_84 = arith.constant 0 : index
    %257 = vector.load %arg11[%256, %c0_84] : memref<64x128xf32, #tpu.memory_space<vmem>>, vector<8x128xf32>
    %258 = arith.truncf %250 : vector<8x32xf32> to vector<8x32xbf16>
    %cst_85 = arith.constant dense<0.000000e+00> : vector<8x128xf32>
    %259 = tpu.matmul %258, %14, %cst_85 {dimension_numbers = #tpu.dot_dimension_numbers<[1], [0], [0], [1], [0, 0, 1, 1], [], []>} : vector<8x32xbf16>, vector<32x128xbf16>, vector<8x128xf32> -> vector<8x128xf32>
    %260 = arith.addf %257, %259 : vector<8x128xf32>
    %261 = arith.mulf %260, %10 : vector<8x128xf32>
    %262 = math.tanh %261 : vector<8x128xf32>
    %263 = vector.extract_strided_slice %262 {offsets = [0, 0], sizes = [8, 32], strides = [1, 1]} : vector<8x128xf32> to vector<8x32xf32>
    %cst_86 = arith.constant 5.000000e-01 : f32
    %264 = vector.broadcast %cst_86 : f32 to vector<8x32xf32>
    %265 = arith.mulf %264, %263 : vector<8x32xf32>
    %cst_87 = arith.constant 5.000000e-01 : f32
    %266 = vector.broadcast %cst_87 : f32 to vector<8x32xf32>
    %267 = arith.addf %265, %266 : vector<8x32xf32>
    %268 = vector.extract_strided_slice %262 {offsets = [0, 32], sizes = [8, 32], strides = [1, 1]} : vector<8x128xf32> to vector<8x32xf32>
    %cst_88 = arith.constant 5.000000e-01 : f32
    %269 = vector.broadcast %cst_88 : f32 to vector<8x32xf32>
    %270 = arith.mulf %269, %268 : vector<8x32xf32>
    %cst_89 = arith.constant 5.000000e-01 : f32
    %271 = vector.broadcast %cst_89 : f32 to vector<8x32xf32>
    %272 = arith.addf %270, %271 : vector<8x32xf32>
    %273 = vector.extract_strided_slice %262 {offsets = [0, 64], sizes = [8, 32], strides = [1, 1]} : vector<8x128xf32> to vector<8x32xf32>
    %274 = vector.extract_strided_slice %262 {offsets = [0, 96], sizes = [8, 32], strides = [1, 1]} : vector<8x128xf32> to vector<8x32xf32>
    %cst_90 = arith.constant 5.000000e-01 : f32
    %275 = vector.broadcast %cst_90 : f32 to vector<8x32xf32>
    %276 = arith.mulf %275, %274 : vector<8x32xf32>
    %cst_91 = arith.constant 5.000000e-01 : f32
    %277 = vector.broadcast %cst_91 : f32 to vector<8x32xf32>
    %278 = arith.addf %276, %277 : vector<8x32xf32>
    %279 = arith.mulf %272, %248 : vector<8x32xf32>
    %280 = arith.mulf %267, %273 : vector<8x32xf32>
    %281 = arith.addf %279, %280 : vector<8x32xf32>
    %282 = math.tanh %281 : vector<8x32xf32>
    %283 = arith.mulf %278, %282 : vector<8x32xf32>
    %284 = arith.truncf %283 : vector<8x32xf32> to vector<8x32xbf16>
    %285 = arith.index_cast %255 : i32 to index
    %c0_92 = arith.constant 0 : index
    %286 = vector.load %arg12[%285, %c0_92] : memref<64x32xbf16, #tpu.memory_space<vmem>>, vector<8x32xbf16>
    tpu.vector_store %arg12[%285, %c0_92], %284 {strides = array<i32>} : memref<64x32xbf16, #tpu.memory_space<vmem>>, vector<8x32xbf16>,
    %c8_i32_93 = arith.constant 8 : i32
    %c0_94 = arith.constant 0 : index
    %c0_95 = arith.constant 0 : index
    %287 = vector.load %arg12[%c0_94, %c0_95] : memref<64x32xbf16, #tpu.memory_space<vmem>>, vector<64x32xbf16>
    %c0_96 = arith.constant 0 : index
    %c0_97 = arith.constant 0 : index
    %288 = vector.load %arg5[%c0_96, %c0_97] : memref<32x128xbf16, #tpu.memory_space<vmem>>, vector<32x128xbf16>
    %c0_98 = arith.constant 0 : index
    %c0_99 = arith.constant 0 : index
    %289 = vector.load %arg6[%c0_98, %c0_99] : memref<32x128xbf16, #tpu.memory_space<vmem>>, vector<32x128xbf16>
    %c0_100 = arith.constant 0 : index
    %c0_101 = arith.constant 0 : index
    %290 = vector.load %arg7[%c0_100, %c0_101] : memref<1x128xf32, #tpu.memory_space<vmem>>, vector<1x128xf32>
    %cst_102 = arith.constant dense<0.000000e+00> : vector<64x128xf32>
    %291 = tpu.matmul %287, %288, %cst_102 {dimension_numbers = #tpu.dot_dimension_numbers<[1], [0], [0], [1], [0, 0, 1, 1], [], []>} : vector<64x32xbf16>, vector<32x128xbf16>, vector<64x128xf32> -> vector<64x128xf32>
    %292 = vector.broadcast %290 : vector<1x128xf32> to vector<64x128xf32>
    %293 = arith.addf %291, %292 : vector<64x128xf32>
    %c0_103 = arith.constant 0 : index
    %c0_104 = arith.constant 0 : index
    %294 = vector.load %arg11[%c0_103, %c0_104] : memref<64x128xf32, #tpu.memory_space<vmem>>, vector<64x128xf32>
    tpu.vector_store %arg11[%c0_103, %c0_104], %293 {strides = array<i32>} : memref<64x128xf32, #tpu.memory_space<vmem>>, vector<64x128xf32>,
    %cst_105 = arith.constant 0.000000e+00 : f32
    %295 = vector.broadcast %cst_105 : f32 to vector<8x32xf32>
    %cst_106 = arith.constant 0.000000e+00 : f32
    %296 = vector.broadcast %cst_106 : f32 to vector<8x32xf32>
    %c0_i32_107 = arith.constant 0 : i32
    %c8_i32_108 = arith.constant 8 : i32
    %297 = arith.muli %c0_i32_107, %c8_i32_108 : i32
    %298 = tpu.assume_multiple %297, 8 : i32
    %299 = arith.index_cast %298 : i32 to index
    %c0_109 = arith.constant 0 : index
    %300 = vector.load %arg11[%299, %c0_109] : memref<64x128xf32, #tpu.memory_space<vmem>>, vector<8x128xf32>
    %301 = arith.truncf %295 : vector<8x32xf32> to vector<8x32xbf16>
    %cst_110 = arith.constant dense<0.000000e+00> : vector<8x128xf32>
    %302 = tpu.matmul %301, %289, %cst_110 {dimension_numbers = #tpu.dot_dimension_numbers<[1], [0], [0], [1], [0, 0, 1, 1], [], []>} : vector<8x32xbf16>, vector<32x128xbf16>, vector<8x128xf32> -> vector<8x128xf32>
    %303 = arith.addf %300, %302 : vector<8x128xf32>
    %304 = arith.mulf %303, %10 : vector<8x128xf32>
    %305 = math.tanh %304 : vector<8x128xf32>
    %306 = vector.extract_strided_slice %305 {offsets = [0, 0], sizes = [8, 32], strides = [1, 1]} : vector<8x128xf32> to vector<8x32xf32>
    %cst_111 = arith.constant 5.000000e-01 : f32
    %307 = vector.broadcast %cst_111 : f32 to vector<8x32xf32>
    %308 = arith.mulf %307, %306 : vector<8x32xf32>
    %cst_112 = arith.constant 5.000000e-01 : f32
    %309 = vector.broadcast %cst_112 : f32 to vector<8x32xf32>
    %310 = arith.addf %308, %309 : vector<8x32xf32>
    %311 = vector.extract_strided_slice %305 {offsets = [0, 32], sizes = [8, 32], strides = [1, 1]} : vector<8x128xf32> to vector<8x32xf32>
    %cst_113 = arith.constant 5.000000e-01 : f32
    %312 = vector.broadcast %cst_113 : f32 to vector<8x32xf32>
    %313 = arith.mulf %312, %311 : vector<8x32xf32>
    %cst_114 = arith.constant 5.000000e-01 : f32
    %314 = vector.broadcast %cst_114 : f32 to vector<8x32xf32>
    %315 = arith.addf %313, %314 : vector<8x32xf32>
    %316 = vector.extract_strided_slice %305 {offsets = [0, 64], sizes = [8, 32], strides = [1, 1]} : vector<8x128xf32> to vector<8x32xf32>
    %317 = vector.extract_strided_slice %305 {offsets = [0, 96], sizes = [8, 32], strides = [1, 1]} : vector<8x128xf32> to vector<8x32xf32>
    %cst_115 = arith.constant 5.000000e-01 : f32
    %318 = vector.broadcast %cst_115 : f32 to vector<8x32xf32>
    %319 = arith.mulf %318, %317 : vector<8x32xf32>
    %cst_116 = arith.constant 5.000000e-01 : f32
    %320 = vector.broadcast %cst_116 : f32 to vector<8x32xf32>
    %321 = arith.addf %319, %320 : vector<8x32xf32>
    %322 = arith.mulf %315, %296 : vector<8x32xf32>
    %323 = arith.mulf %310, %316 : vector<8x32xf32>
    %324 = arith.addf %322, %323 : vector<8x32xf32>
    %325 = math.tanh %324 : vector<8x32xf32>
    %326 = arith.mulf %321, %325 : vector<8x32xf32>
    %327 = arith.truncf %326 : vector<8x32xf32> to vector<8x32xbf16>
    %328 = arith.index_cast %298 : i32 to index
    %c0_117 = arith.constant 0 : index
    %329 = vector.load %arg12[%328, %c0_117] : memref<64x32xbf16, #tpu.memory_space<vmem>>, vector<8x32xbf16>
    tpu.vector_store %arg12[%328, %c0_117], %327 {strides = array<i32>} : memref<64x32xbf16, #tpu.memory_space<vmem>>, vector<8x32xbf16>,
    %c1_i32_118 = arith.constant 1 : i32
    %c8_i32_119 = arith.constant 8 : i32
    %330 = arith.muli %c1_i32_118, %c8_i32_119 : i32
    %331 = tpu.assume_multiple %330, 8 : i32
    %332 = arith.index_cast %331 : i32 to index
    %c0_120 = arith.constant 0 : index
    %333 = vector.load %arg11[%332, %c0_120] : memref<64x128xf32, #tpu.memory_space<vmem>>, vector<8x128xf32>
    %334 = arith.truncf %326 : vector<8x32xf32> to vector<8x32xbf16>
    %cst_121 = arith.constant dense<0.000000e+00> : vector<8x128xf32>
    %335 = tpu.matmul %334, %289, %cst_121 {dimension_numbers = #tpu.dot_dimension_numbers<[1], [0], [0], [1], [0, 0, 1, 1], [], []>} : vector<8x32xbf16>, vector<32x128xbf16>, vector<8x128xf32> -> vector<8x128xf32>
    %336 = arith.addf %333, %335 : vector<8x128xf32>
    %337 = arith.mulf %336, %10 : vector<8x128xf32>
    %338 = math.tanh %337 : vector<8x128xf32>
    %339 = vector.extract_strided_slice %338 {offsets = [0, 0], sizes = [8, 32], strides = [1, 1]} : vector<8x128xf32> to vector<8x32xf32>
    %cst_122 = arith.constant 5.000000e-01 : f32
    %340 = vector.broadcast %cst_122 : f32 to vector<8x32xf32>
    %341 = arith.mulf %340, %339 : vector<8x32xf32>
    %cst_123 = arith.constant 5.000000e-01 : f32
    %342 = vector.broadcast %cst_123 : f32 to vector<8x32xf32>
    %343 = arith.addf %341, %342 : vector<8x32xf32>
    %344 = vector.extract_strided_slice %338 {offsets = [0, 32], sizes = [8, 32], strides = [1, 1]} : vector<8x128xf32> to vector<8x32xf32>
    %cst_124 = arith.constant 5.000000e-01 : f32
    %345 = vector.broadcast %cst_124 : f32 to vector<8x32xf32>
    %346 = arith.mulf %345, %344 : vector<8x32xf32>
    %cst_125 = arith.constant 5.000000e-01 : f32
    %347 = vector.broadcast %cst_125 : f32 to vector<8x32xf32>
    %348 = arith.addf %346, %347 : vector<8x32xf32>
    %349 = vector.extract_strided_slice %338 {offsets = [0, 64], sizes = [8, 32], strides = [1, 1]} : vector<8x128xf32> to vector<8x32xf32>
    %350 = vector.extract_strided_slice %338 {offsets = [0, 96], sizes = [8, 32], strides = [1, 1]} : vector<8x128xf32> to vector<8x32xf32>
    %cst_126 = arith.constant 5.000000e-01 : f32
    %351 = vector.broadcast %cst_126 : f32 to vector<8x32xf32>
    %352 = arith.mulf %351, %350 : vector<8x32xf32>
    %cst_127 = arith.constant 5.000000e-01 : f32
    %353 = vector.broadcast %cst_127 : f32 to vector<8x32xf32>
    %354 = arith.addf %352, %353 : vector<8x32xf32>
    %355 = arith.mulf %348, %324 : vector<8x32xf32>
    %356 = arith.mulf %343, %349 : vector<8x32xf32>
    %357 = arith.addf %355, %356 : vector<8x32xf32>
    %358 = math.tanh %357 : vector<8x32xf32>
    %359 = arith.mulf %354, %358 : vector<8x32xf32>
    %360 = arith.truncf %359 : vector<8x32xf32> to vector<8x32xbf16>
    %361 = arith.index_cast %331 : i32 to index
    %c0_128 = arith.constant 0 : index
    %362 = vector.load %arg12[%361, %c0_128] : memref<64x32xbf16, #tpu.memory_space<vmem>>, vector<8x32xbf16>
    tpu.vector_store %arg12[%361, %c0_128], %360 {strides = array<i32>} : memref<64x32xbf16, #tpu.memory_space<vmem>>, vector<8x32xbf16>,
    %c2_i32_129 = arith.constant 2 : i32
    %c8_i32_130 = arith.constant 8 : i32
    %363 = arith.muli %c2_i32_129, %c8_i32_130 : i32
    %364 = tpu.assume_multiple %363, 8 : i32
    %365 = arith.index_cast %364 : i32 to index
    %c0_131 = arith.constant 0 : index
    %366 = vector.load %arg11[%365, %c0_131] : memref<64x128xf32, #tpu.memory_space<vmem>>, vector<8x128xf32>
    %367 = arith.truncf %359 : vector<8x32xf32> to vector<8x32xbf16>
    %cst_132 = arith.constant dense<0.000000e+00> : vector<8x128xf32>
    %368 = tpu.matmul %367, %289, %cst_132 {dimension_numbers = #tpu.dot_dimension_numbers<[1], [0], [0], [1], [0, 0, 1, 1], [], []>} : vector<8x32xbf16>, vector<32x128xbf16>, vector<8x128xf32> -> vector<8x128xf32>
    %369 = arith.addf %366, %368 : vector<8x128xf32>
    %370 = arith.mulf %369, %10 : vector<8x128xf32>
    %371 = math.tanh %370 : vector<8x128xf32>
    %372 = vector.extract_strided_slice %371 {offsets = [0, 0], sizes = [8, 32], strides = [1, 1]} : vector<8x128xf32> to vector<8x32xf32>
    %cst_133 = arith.constant 5.000000e-01 : f32
    %373 = vector.broadcast %cst_133 : f32 to vector<8x32xf32>
    %374 = arith.mulf %373, %372 : vector<8x32xf32>
    %cst_134 = arith.constant 5.000000e-01 : f32
    %375 = vector.broadcast %cst_134 : f32 to vector<8x32xf32>
    %376 = arith.addf %374, %375 : vector<8x32xf32>
    %377 = vector.extract_strided_slice %371 {offsets = [0, 32], sizes = [8, 32], strides = [1, 1]} : vector<8x128xf32> to vector<8x32xf32>
    %cst_135 = arith.constant 5.000000e-01 : f32
    %378 = vector.broadcast %cst_135 : f32 to vector<8x32xf32>
    %379 = arith.mulf %378, %377 : vector<8x32xf32>
    %cst_136 = arith.constant 5.000000e-01 : f32
    %380 = vector.broadcast %cst_136 : f32 to vector<8x32xf32>
    %381 = arith.addf %379, %380 : vector<8x32xf32>
    %382 = vector.extract_strided_slice %371 {offsets = [0, 64], sizes = [8, 32], strides = [1, 1]} : vector<8x128xf32> to vector<8x32xf32>
    %383 = vector.extract_strided_slice %371 {offsets = [0, 96], sizes = [8, 32], strides = [1, 1]} : vector<8x128xf32> to vector<8x32xf32>
    %cst_137 = arith.constant 5.000000e-01 : f32
    %384 = vector.broadcast %cst_137 : f32 to vector<8x32xf32>
    %385 = arith.mulf %384, %383 : vector<8x32xf32>
    %cst_138 = arith.constant 5.000000e-01 : f32
    %386 = vector.broadcast %cst_138 : f32 to vector<8x32xf32>
    %387 = arith.addf %385, %386 : vector<8x32xf32>
    %388 = arith.mulf %381, %357 : vector<8x32xf32>
    %389 = arith.mulf %376, %382 : vector<8x32xf32>
    %390 = arith.addf %388, %389 : vector<8x32xf32>
    %391 = math.tanh %390 : vector<8x32xf32>
    %392 = arith.mulf %387, %391 : vector<8x32xf32>
    %393 = arith.truncf %392 : vector<8x32xf32> to vector<8x32xbf16>
    %394 = arith.index_cast %364 : i32 to index
    %c0_139 = arith.constant 0 : index
    %395 = vector.load %arg12[%394, %c0_139] : memref<64x32xbf16, #tpu.memory_space<vmem>>, vector<8x32xbf16>
    tpu.vector_store %arg12[%394, %c0_139], %393 {strides = array<i32>} : memref<64x32xbf16, #tpu.memory_space<vmem>>, vector<8x32xbf16>,
    %c3_i32_140 = arith.constant 3 : i32
    %c8_i32_141 = arith.constant 8 : i32
    %396 = arith.muli %c3_i32_140, %c8_i32_141 : i32
    %397 = tpu.assume_multiple %396, 8 : i32
    %398 = arith.index_cast %397 : i32 to index
    %c0_142 = arith.constant 0 : index
    %399 = vector.load %arg11[%398, %c0_142] : memref<64x128xf32, #tpu.memory_space<vmem>>, vector<8x128xf32>
    %400 = arith.truncf %392 : vector<8x32xf32> to vector<8x32xbf16>
    %cst_143 = arith.constant dense<0.000000e+00> : vector<8x128xf32>
    %401 = tpu.matmul %400, %289, %cst_143 {dimension_numbers = #tpu.dot_dimension_numbers<[1], [0], [0], [1], [0, 0, 1, 1], [], []>} : vector<8x32xbf16>, vector<32x128xbf16>, vector<8x128xf32> -> vector<8x128xf32>
    %402 = arith.addf %399, %401 : vector<8x128xf32>
    %403 = arith.mulf %402, %10 : vector<8x128xf32>
    %404 = math.tanh %403 : vector<8x128xf32>
    %405 = vector.extract_strided_slice %404 {offsets = [0, 0], sizes = [8, 32], strides = [1, 1]} : vector<8x128xf32> to vector<8x32xf32>
    %cst_144 = arith.constant 5.000000e-01 : f32
    %406 = vector.broadcast %cst_144 : f32 to vector<8x32xf32>
    %407 = arith.mulf %406, %405 : vector<8x32xf32>
    %cst_145 = arith.constant 5.000000e-01 : f32
    %408 = vector.broadcast %cst_145 : f32 to vector<8x32xf32>
    %409 = arith.addf %407, %408 : vector<8x32xf32>
    %410 = vector.extract_strided_slice %404 {offsets = [0, 32], sizes = [8, 32], strides = [1, 1]} : vector<8x128xf32> to vector<8x32xf32>
    %cst_146 = arith.constant 5.000000e-01 : f32
    %411 = vector.broadcast %cst_146 : f32 to vector<8x32xf32>
    %412 = arith.mulf %411, %410 : vector<8x32xf32>
    %cst_147 = arith.constant 5.000000e-01 : f32
    %413 = vector.broadcast %cst_147 : f32 to vector<8x32xf32>
    %414 = arith.addf %412, %413 : vector<8x32xf32>
    %415 = vector.extract_strided_slice %404 {offsets = [0, 64], sizes = [8, 32], strides = [1, 1]} : vector<8x128xf32> to vector<8x32xf32>
    %416 = vector.extract_strided_slice %404 {offsets = [0, 96], sizes = [8, 32], strides = [1, 1]} : vector<8x128xf32> to vector<8x32xf32>
    %cst_148 = arith.constant 5.000000e-01 : f32
    %417 = vector.broadcast %cst_148 : f32 to vector<8x32xf32>
    %418 = arith.mulf %417, %416 : vector<8x32xf32>
    %cst_149 = arith.constant 5.000000e-01 : f32
    %419 = vector.broadcast %cst_149 : f32 to vector<8x32xf32>
    %420 = arith.addf %418, %419 : vector<8x32xf32>
    %421 = arith.mulf %414, %390 : vector<8x32xf32>
    %422 = arith.mulf %409, %415 : vector<8x32xf32>
    %423 = arith.addf %421, %422 : vector<8x32xf32>
    %424 = math.tanh %423 : vector<8x32xf32>
    %425 = arith.mulf %420, %424 : vector<8x32xf32>
    %426 = arith.truncf %425 : vector<8x32xf32> to vector<8x32xbf16>
    %427 = arith.index_cast %397 : i32 to index
    %c0_150 = arith.constant 0 : index
    %428 = vector.load %arg12[%427, %c0_150] : memref<64x32xbf16, #tpu.memory_space<vmem>>, vector<8x32xbf16>
    tpu.vector_store %arg12[%427, %c0_150], %426 {strides = array<i32>} : memref<64x32xbf16, #tpu.memory_space<vmem>>, vector<8x32xbf16>,
    %c4_i32_151 = arith.constant 4 : i32
    %c8_i32_152 = arith.constant 8 : i32
    %429 = arith.muli %c4_i32_151, %c8_i32_152 : i32
    %430 = tpu.assume_multiple %429, 8 : i32
    %431 = arith.index_cast %430 : i32 to index
    %c0_153 = arith.constant 0 : index
    %432 = vector.load %arg11[%431, %c0_153] : memref<64x128xf32, #tpu.memory_space<vmem>>, vector<8x128xf32>
    %433 = arith.truncf %425 : vector<8x32xf32> to vector<8x32xbf16>
    %cst_154 = arith.constant dense<0.000000e+00> : vector<8x128xf32>
    %434 = tpu.matmul %433, %289, %cst_154 {dimension_numbers = #tpu.dot_dimension_numbers<[1], [0], [0], [1], [0, 0, 1, 1], [], []>} : vector<8x32xbf16>, vector<32x128xbf16>, vector<8x128xf32> -> vector<8x128xf32>
    %435 = arith.addf %432, %434 : vector<8x128xf32>
    %436 = arith.mulf %435, %10 : vector<8x128xf32>
    %437 = math.tanh %436 : vector<8x128xf32>
    %438 = vector.extract_strided_slice %437 {offsets = [0, 0], sizes = [8, 32], strides = [1, 1]} : vector<8x128xf32> to vector<8x32xf32>
    %cst_155 = arith.constant 5.000000e-01 : f32
    %439 = vector.broadcast %cst_155 : f32 to vector<8x32xf32>
    %440 = arith.mulf %439, %438 : vector<8x32xf32>
    %cst_156 = arith.constant 5.000000e-01 : f32
    %441 = vector.broadcast %cst_156 : f32 to vector<8x32xf32>
    %442 = arith.addf %440, %441 : vector<8x32xf32>
    %443 = vector.extract_strided_slice %437 {offsets = [0, 32], sizes = [8, 32], strides = [1, 1]} : vector<8x128xf32> to vector<8x32xf32>
    %cst_157 = arith.constant 5.000000e-01 : f32
    %444 = vector.broadcast %cst_157 : f32 to vector<8x32xf32>
    %445 = arith.mulf %444, %443 : vector<8x32xf32>
    %cst_158 = arith.constant 5.000000e-01 : f32
    %446 = vector.broadcast %cst_158 : f32 to vector<8x32xf32>
    %447 = arith.addf %445, %446 : vector<8x32xf32>
    %448 = vector.extract_strided_slice %437 {offsets = [0, 64], sizes = [8, 32], strides = [1, 1]} : vector<8x128xf32> to vector<8x32xf32>
    %449 = vector.extract_strided_slice %437 {offsets = [0, 96], sizes = [8, 32], strides = [1, 1]} : vector<8x128xf32> to vector<8x32xf32>
    %cst_159 = arith.constant 5.000000e-01 : f32
    %450 = vector.broadcast %cst_159 : f32 to vector<8x32xf32>
    %451 = arith.mulf %450, %449 : vector<8x32xf32>
    %cst_160 = arith.constant 5.000000e-01 : f32
    %452 = vector.broadcast %cst_160 : f32 to vector<8x32xf32>
    %453 = arith.addf %451, %452 : vector<8x32xf32>
    %454 = arith.mulf %447, %423 : vector<8x32xf32>
    %455 = arith.mulf %442, %448 : vector<8x32xf32>
    %456 = arith.addf %454, %455 : vector<8x32xf32>
    %457 = math.tanh %456 : vector<8x32xf32>
    %458 = arith.mulf %453, %457 : vector<8x32xf32>
    %459 = arith.truncf %458 : vector<8x32xf32> to vector<8x32xbf16>
    %460 = arith.index_cast %430 : i32 to index
    %c0_161 = arith.constant 0 : index
    %461 = vector.load %arg12[%460, %c0_161] : memref<64x32xbf16, #tpu.memory_space<vmem>>, vector<8x32xbf16>
    tpu.vector_store %arg12[%460, %c0_161], %459 {strides = array<i32>} : memref<64x32xbf16, #tpu.memory_space<vmem>>, vector<8x32xbf16>,
    %c5_i32_162 = arith.constant 5 : i32
    %c8_i32_163 = arith.constant 8 : i32
    %462 = arith.muli %c5_i32_162, %c8_i32_163 : i32
    %463 = tpu.assume_multiple %462, 8 : i32
    %464 = arith.index_cast %463 : i32 to index
    %c0_164 = arith.constant 0 : index
    %465 = vector.load %arg11[%464, %c0_164] : memref<64x128xf32, #tpu.memory_space<vmem>>, vector<8x128xf32>
    %466 = arith.truncf %458 : vector<8x32xf32> to vector<8x32xbf16>
    %cst_165 = arith.constant dense<0.000000e+00> : vector<8x128xf32>
    %467 = tpu.matmul %466, %289, %cst_165 {dimension_numbers = #tpu.dot_dimension_numbers<[1], [0], [0], [1], [0, 0, 1, 1], [], []>} : vector<8x32xbf16>, vector<32x128xbf16>, vector<8x128xf32> -> vector<8x128xf32>
    %468 = arith.addf %465, %467 : vector<8x128xf32>
    %469 = arith.mulf %468, %10 : vector<8x128xf32>
    %470 = math.tanh %469 : vector<8x128xf32>
    %471 = vector.extract_strided_slice %470 {offsets = [0, 0], sizes = [8, 32], strides = [1, 1]} : vector<8x128xf32> to vector<8x32xf32>
    %cst_166 = arith.constant 5.000000e-01 : f32
    %472 = vector.broadcast %cst_166 : f32 to vector<8x32xf32>
    %473 = arith.mulf %472, %471 : vector<8x32xf32>
    %cst_167 = arith.constant 5.000000e-01 : f32
    %474 = vector.broadcast %cst_167 : f32 to vector<8x32xf32>
    %475 = arith.addf %473, %474 : vector<8x32xf32>
    %476 = vector.extract_strided_slice %470 {offsets = [0, 32], sizes = [8, 32], strides = [1, 1]} : vector<8x128xf32> to vector<8x32xf32>
    %cst_168 = arith.constant 5.000000e-01 : f32
    %477 = vector.broadcast %cst_168 : f32 to vector<8x32xf32>
    %478 = arith.mulf %477, %476 : vector<8x32xf32>
    %cst_169 = arith.constant 5.000000e-01 : f32
    %479 = vector.broadcast %cst_169 : f32 to vector<8x32xf32>
    %480 = arith.addf %478, %479 : vector<8x32xf32>
    %481 = vector.extract_strided_slice %470 {offsets = [0, 64], sizes = [8, 32], strides = [1, 1]} : vector<8x128xf32> to vector<8x32xf32>
    %482 = vector.extract_strided_slice %470 {offsets = [0, 96], sizes = [8, 32], strides = [1, 1]} : vector<8x128xf32> to vector<8x32xf32>
    %cst_170 = arith.constant 5.000000e-01 : f32
    %483 = vector.broadcast %cst_170 : f32 to vector<8x32xf32>
    %484 = arith.mulf %483, %482 : vector<8x32xf32>
    %cst_171 = arith.constant 5.000000e-01 : f32
    %485 = vector.broadcast %cst_171 : f32 to vector<8x32xf32>
    %486 = arith.addf %484, %485 : vector<8x32xf32>
    %487 = arith.mulf %480, %456 : vector<8x32xf32>
    %488 = arith.mulf %475, %481 : vector<8x32xf32>
    %489 = arith.addf %487, %488 : vector<8x32xf32>
    %490 = math.tanh %489 : vector<8x32xf32>
    %491 = arith.mulf %486, %490 : vector<8x32xf32>
    %492 = arith.truncf %491 : vector<8x32xf32> to vector<8x32xbf16>
    %493 = arith.index_cast %463 : i32 to index
    %c0_172 = arith.constant 0 : index
    %494 = vector.load %arg12[%493, %c0_172] : memref<64x32xbf16, #tpu.memory_space<vmem>>, vector<8x32xbf16>
    tpu.vector_store %arg12[%493, %c0_172], %492 {strides = array<i32>} : memref<64x32xbf16, #tpu.memory_space<vmem>>, vector<8x32xbf16>,
    %c6_i32_173 = arith.constant 6 : i32
    %c8_i32_174 = arith.constant 8 : i32
    %495 = arith.muli %c6_i32_173, %c8_i32_174 : i32
    %496 = tpu.assume_multiple %495, 8 : i32
    %497 = arith.index_cast %496 : i32 to index
    %c0_175 = arith.constant 0 : index
    %498 = vector.load %arg11[%497, %c0_175] : memref<64x128xf32, #tpu.memory_space<vmem>>, vector<8x128xf32>
    %499 = arith.truncf %491 : vector<8x32xf32> to vector<8x32xbf16>
    %cst_176 = arith.constant dense<0.000000e+00> : vector<8x128xf32>
    %500 = tpu.matmul %499, %289, %cst_176 {dimension_numbers = #tpu.dot_dimension_numbers<[1], [0], [0], [1], [0, 0, 1, 1], [], []>} : vector<8x32xbf16>, vector<32x128xbf16>, vector<8x128xf32> -> vector<8x128xf32>
    %501 = arith.addf %498, %500 : vector<8x128xf32>
    %502 = arith.mulf %501, %10 : vector<8x128xf32>
    %503 = math.tanh %502 : vector<8x128xf32>
    %504 = vector.extract_strided_slice %503 {offsets = [0, 0], sizes = [8, 32], strides = [1, 1]} : vector<8x128xf32> to vector<8x32xf32>
    %cst_177 = arith.constant 5.000000e-01 : f32
    %505 = vector.broadcast %cst_177 : f32 to vector<8x32xf32>
    %506 = arith.mulf %505, %504 : vector<8x32xf32>
    %cst_178 = arith.constant 5.000000e-01 : f32
    %507 = vector.broadcast %cst_178 : f32 to vector<8x32xf32>
    %508 = arith.addf %506, %507 : vector<8x32xf32>
    %509 = vector.extract_strided_slice %503 {offsets = [0, 32], sizes = [8, 32], strides = [1, 1]} : vector<8x128xf32> to vector<8x32xf32>
    %cst_179 = arith.constant 5.000000e-01 : f32
    %510 = vector.broadcast %cst_179 : f32 to vector<8x32xf32>
    %511 = arith.mulf %510, %509 : vector<8x32xf32>
    %cst_180 = arith.constant 5.000000e-01 : f32
    %512 = vector.broadcast %cst_180 : f32 to vector<8x32xf32>
    %513 = arith.addf %511, %512 : vector<8x32xf32>
    %514 = vector.extract_strided_slice %503 {offsets = [0, 64], sizes = [8, 32], strides = [1, 1]} : vector<8x128xf32> to vector<8x32xf32>
    %515 = vector.extract_strided_slice %503 {offsets = [0, 96], sizes = [8, 32], strides = [1, 1]} : vector<8x128xf32> to vector<8x32xf32>
    %cst_181 = arith.constant 5.000000e-01 : f32
    %516 = vector.broadcast %cst_181 : f32 to vector<8x32xf32>
    %517 = arith.mulf %516, %515 : vector<8x32xf32>
    %cst_182 = arith.constant 5.000000e-01 : f32
    %518 = vector.broadcast %cst_182 : f32 to vector<8x32xf32>
    %519 = arith.addf %517, %518 : vector<8x32xf32>
    %520 = arith.mulf %513, %489 : vector<8x32xf32>
    %521 = arith.mulf %508, %514 : vector<8x32xf32>
    %522 = arith.addf %520, %521 : vector<8x32xf32>
    %523 = math.tanh %522 : vector<8x32xf32>
    %524 = arith.mulf %519, %523 : vector<8x32xf32>
    %525 = arith.truncf %524 : vector<8x32xf32> to vector<8x32xbf16>
    %526 = arith.index_cast %496 : i32 to index
    %c0_183 = arith.constant 0 : index
    %527 = vector.load %arg12[%526, %c0_183] : memref<64x32xbf16, #tpu.memory_space<vmem>>, vector<8x32xbf16>
    tpu.vector_store %arg12[%526, %c0_183], %525 {strides = array<i32>} : memref<64x32xbf16, #tpu.memory_space<vmem>>, vector<8x32xbf16>,
    %c7_i32_184 = arith.constant 7 : i32
    %c8_i32_185 = arith.constant 8 : i32
    %528 = arith.muli %c7_i32_184, %c8_i32_185 : i32
    %529 = tpu.assume_multiple %528, 8 : i32
    %530 = arith.index_cast %529 : i32 to index
    %c0_186 = arith.constant 0 : index
    %531 = vector.load %arg11[%530, %c0_186] : memref<64x128xf32, #tpu.memory_space<vmem>>, vector<8x128xf32>
    %532 = arith.truncf %524 : vector<8x32xf32> to vector<8x32xbf16>
    %cst_187 = arith.constant dense<0.000000e+00> : vector<8x128xf32>
    %533 = tpu.matmul %532, %289, %cst_187 {dimension_numbers = #tpu.dot_dimension_numbers<[1], [0], [0], [1], [0, 0, 1, 1], [], []>} : vector<8x32xbf16>, vector<32x128xbf16>, vector<8x128xf32> -> vector<8x128xf32>
    %534 = arith.addf %531, %533 : vector<8x128xf32>
    %535 = arith.mulf %534, %10 : vector<8x128xf32>
    %536 = math.tanh %535 : vector<8x128xf32>
    %537 = vector.extract_strided_slice %536 {offsets = [0, 0], sizes = [8, 32], strides = [1, 1]} : vector<8x128xf32> to vector<8x32xf32>
    %cst_188 = arith.constant 5.000000e-01 : f32
    %538 = vector.broadcast %cst_188 : f32 to vector<8x32xf32>
    %539 = arith.mulf %538, %537 : vector<8x32xf32>
    %cst_189 = arith.constant 5.000000e-01 : f32
    %540 = vector.broadcast %cst_189 : f32 to vector<8x32xf32>
    %541 = arith.addf %539, %540 : vector<8x32xf32>
    %542 = vector.extract_strided_slice %536 {offsets = [0, 32], sizes = [8, 32], strides = [1, 1]} : vector<8x128xf32> to vector<8x32xf32>
    %cst_190 = arith.constant 5.000000e-01 : f32
    %543 = vector.broadcast %cst_190 : f32 to vector<8x32xf32>
    %544 = arith.mulf %543, %542 : vector<8x32xf32>
    %cst_191 = arith.constant 5.000000e-01 : f32
    %545 = vector.broadcast %cst_191 : f32 to vector<8x32xf32>
    %546 = arith.addf %544, %545 : vector<8x32xf32>
    %547 = vector.extract_strided_slice %536 {offsets = [0, 64], sizes = [8, 32], strides = [1, 1]} : vector<8x128xf32> to vector<8x32xf32>
    %548 = vector.extract_strided_slice %536 {offsets = [0, 96], sizes = [8, 32], strides = [1, 1]} : vector<8x128xf32> to vector<8x32xf32>
    %cst_192 = arith.constant 5.000000e-01 : f32
    %549 = vector.broadcast %cst_192 : f32 to vector<8x32xf32>
    %550 = arith.mulf %549, %548 : vector<8x32xf32>
    %cst_193 = arith.constant 5.000000e-01 : f32
    %551 = vector.broadcast %cst_193 : f32 to vector<8x32xf32>
    %552 = arith.addf %550, %551 : vector<8x32xf32>
    %553 = arith.mulf %546, %522 : vector<8x32xf32>
    %554 = arith.mulf %541, %547 : vector<8x32xf32>
    %555 = arith.addf %553, %554 : vector<8x32xf32>
    %556 = math.tanh %555 : vector<8x32xf32>
    %557 = arith.mulf %552, %556 : vector<8x32xf32>
    %558 = arith.truncf %557 : vector<8x32xf32> to vector<8x32xbf16>
    %559 = arith.index_cast %529 : i32 to index
    %c0_194 = arith.constant 0 : index
    %560 = vector.load %arg12[%559, %c0_194] : memref<64x32xbf16, #tpu.memory_space<vmem>>, vector<8x32xbf16>
    tpu.vector_store %arg12[%559, %c0_194], %558 {strides = array<i32>} : memref<64x32xbf16, #tpu.memory_space<vmem>>, vector<8x32xbf16>,
    %c8_i32_195 = arith.constant 8 : i32
    %c0_196 = arith.constant 0 : index
    %c0_197 = arith.constant 0 : index
    %561 = vector.load %arg12[%c0_196, %c0_197] : memref<64x32xbf16, #tpu.memory_space<vmem>>, vector<64x32xbf16>
    %562 = arith.extf %561 : vector<64x32xbf16> to vector<64x32xf32>
    %cst_198 = arith.constant 0.000000e+00 : f32
    %563 = vector.broadcast %cst_198 : f32 to vector<64x32xf32>
    %564 = arith.maximumf %562, %563 : vector<64x32xf32>
    %c0_199 = arith.constant 0 : index
    %c0_200 = arith.constant 0 : index
    %565 = vector.load %arg8[%c0_199, %c0_200] : memref<1x32xf32, #tpu.memory_space<vmem>>, vector<1x32xf32>
    %566 = vector.broadcast %565 : vector<1x32xf32> to vector<64x32xf32>
    %567 = arith.mulf %564, %566 : vector<64x32xf32>
    %568 = vector.shape_cast %567 : vector<64x32xf32> to vector<8x8x32xf32>
    %cst_201 = arith.constant dense<0.000000e+00> : vector<8x8xf32>
    %569 = vector.multi_reduction <add>, %568, %cst_201 [2] : vector<8x8x32xf32> to vector<8x8xf32>
    %c0_202 = arith.constant 0 : index
    %570 = memref.load %arg9[%c0_202] : memref<1xf32, #tpu.memory_space<smem>>
    %571 = vector.broadcast %570 : f32 to vector<8x8xf32>
    %572 = arith.addf %569, %571 : vector<8x8xf32>
    %c0_203 = arith.constant 0 : index
    %c0_204 = arith.constant 0 : index
    %c0_205 = arith.constant 0 : index
    %573 = vector.load %arg10[%c0_203, %c0_204, %c0_205] : memref<1x8x8xf32, #tpu.memory_space<vmem>>, vector<1x8x8xf32>
    %574 = vector.shape_cast %573 : vector<1x8x8xf32> to vector<8x8xf32>
    %575 = vector.shape_cast %572 : vector<8x8xf32> to vector<1x8x8xf32>
    tpu.vector_store %arg10[%c0_203, %c0_204, %c0_205], %575 {strides = array<i32>} : memref<1x8x8xf32, #tpu.memory_space<vmem>>, vector<1x8x8xf32>,
    return
  }
  func.func @transform_0(%arg0: i32) -> (i32, i32, i32) {
    %c0_i32 = arith.constant 0 : i32
    %c0_i32_0 = arith.constant 0 : i32
    %c0_i32_1 = arith.constant 0 : i32
    return %arg0, %c0_i32, %c0_i32_0 : i32, i32, i32
  }
  func.func @transform_1(%arg0: i32) -> (i32, i32) {
    %c0_i32 = arith.constant 0 : i32
    %c0_i32_0 = arith.constant 0 : i32
    %c0_i32_1 = arith.constant 0 : i32
    return %c0_i32, %c0_i32_0 : i32, i32
  }
  func.func @transform_2(%arg0: i32) -> (i32, i32) {
    %c0_i32 = arith.constant 0 : i32
    %c0_i32_0 = arith.constant 0 : i32
    %c0_i32_1 = arith.constant 0 : i32
    return %c0_i32, %c0_i32_0 : i32, i32
  }
  func.func @transform_3(%arg0: i32) -> (i32, i32) {
    %c0_i32 = arith.constant 0 : i32
    %c0_i32_0 = arith.constant 0 : i32
    %c0_i32_1 = arith.constant 0 : i32
    return %c0_i32, %c0_i32_0 : i32, i32
  }
  func.func @transform_4(%arg0: i32) -> (i32, i32) {
    %c0_i32 = arith.constant 0 : i32
    %c0_i32_0 = arith.constant 0 : i32
    %c0_i32_1 = arith.constant 0 : i32
    return %c0_i32, %c0_i32_0 : i32, i32
  }
  func.func @transform_5(%arg0: i32) -> (i32, i32) {
    %c0_i32 = arith.constant 0 : i32
    %c0_i32_0 = arith.constant 0 : i32
    %c0_i32_1 = arith.constant 0 : i32
    return %c0_i32, %c0_i32_0 : i32, i32
  }
  func.func @transform_6(%arg0: i32) -> (i32, i32) {
    %c0_i32 = arith.constant 0 : i32
    %c0_i32_0 = arith.constant 0 : i32
    %c0_i32_1 = arith.constant 0 : i32
    return %c0_i32, %c0_i32_0 : i32, i32
  }
  func.func @transform_7(%arg0: i32) -> (i32, i32) {
    %c0_i32 = arith.constant 0 : i32
    %c0_i32_0 = arith.constant 0 : i32
    %c0_i32_1 = arith.constant 0 : i32
    return %c0_i32, %c0_i32_0 : i32, i32
  }
  func.func @transform_8(%arg0: i32) -> i32 {
    %c0_i32 = arith.constant 0 : i32
    %c0_i32_0 = arith.constant 0 : i32
    return %c0_i32 : i32
  }
  func.func @transform_9(%arg0: i32) -> (i32, i32, i32) {
    %c0_i32 = arith.constant 0 : i32
    %c0_i32_0 = arith.constant 0 : i32
    %c0_i32_1 = arith.constant 0 : i32
    return %arg0, %c0_i32, %c0_i32_0 : i32, i32, i32
  }
}

</mosaic_0001>

<bundles_post_ra>
// kernel: rnn_forward.1
= control target key start
LH: loop header
LB: loop body
LE: loop exit
PB: predicated region body
PF: predicated region fallthrough
CT: control target
= control target key end

     0   :  { %s2487_s11 = smov 0   ;;  %s2915_s0 = inlined_call_operand.vmem [shape: f32[2,64,4], index: 0, kind: input, shape index: {}]   ;;  %s2916_s1 = inlined_call_operand.vmem [shape: bf16[4,128], index: 1, kind: input, shape index: {}]   ;;  %s2917_s2 = inlined_call_operand.vmem [shape: bf16[32,128], index: 2, kind: input, shape index: {}]   ;;  %s2918_s3 = inlined_call_operand.vmem [shape: f32[1,128], index: 3, kind: input, shape index: {}]   ;;  %s2919_s4 = inlined_call_operand.vmem [shape: bf16[32,128], index: 4, kind: input, shape index: {}]   ;;  %s2920_s5 = inlined_call_operand.vmem [shape: bf16[32,128], index: 5, kind: input, shape index: {}]   ;;  %s2921_s6 = inlined_call_operand.vmem [shape: f32[1,128], index: 6, kind: input, shape index: {}]   ;;  %s2922_s7 = inlined_call_operand.vmem [shape: f32[1,32], index: 7, kind: input, shape index: {}]   ;;  %s2923_s8 = inlined_call_operand.<no memory space> [shape: f32[1], index: 8, kind: input, shape index: {}]   ;;  %s2924_s9 = inlined_call_operand.vmem [shape: f32[2,8,8], index: 9, kind: output, shape index: {}]  }
   0x1   :  { %14 = sst [smem:[#allocation4]] %s2923_s8 }
   0x2 LB: > { %s2025_s12 = sadd.s32 4294967295, %s2426_s11   ;;  %p2029_p0 = scmp.ge.s32.totalorder %s2426_s11, 1  ;;  %s2426_s11 = sphi %s2487_s11, %s20_s11  }
   0x3   : > { %p288_p1 = scmp.lt.s32.totalorder %s2426_s11, 3 }
   0x5   : > { %p289_p2 = pnand %p2029_p0, %p288_p1 }
   0x6   : > { %p323_p3 = scmp.lt.s32.totalorder (!%p289_p2), %s2025_s12, 1  ;;  %s2432_s24 = smov (!%p289_p2), 64  }
   0x7   : > { %292 = sbr.rel (%p289_p2) target bundleno = 10586 (0x295a), region = 56  ;;  %s2433_s25 = smov (!%p289_p2), 32  }
   0xc   : > { %v2498_v0 = vld [vmem:[%s2917_s2 + $0x8] sm:$0xff]   ;;  %v2428_v1 = vmov 0.0   ;;  %v347_v2 = vld [vmem:[%s2916_s1] sm:$0x3]  ;;  %vm376_vm0 = vcmask 1041408   ;;  %s2926_s12 = smov (!%p323_p3, %s2025_s12), 1  ;;  %v333_v12 = vlaneseq }
   0xd   : > { %2191 = vmatprep.subr.bf16.mxu1 %v2428_v1  ;;  %2331 = vmatprep.subr.msk.bf16.mxu0 %vm376_vm0, %v347_v2  ;;  %v378_v3 = vsel %vm376_vm0, %v347_v2, 0  ;;  %v2508_v4 = vld [vmem:[%s2917_s2] sm:$0xff]   ;;  %vm2429_vm1 = vmmov 0   ;;  %s2086_s18 = sshll.u32 %s2926_s12, 6  ;;  %vm363_vm2 = vcmask 31744   ;;  %v2430_v10 = vmov 0  }
   0xe   : > { %2192 = vmatpush3.bf16.msra.mxu1 %v2498_v0  ;;  %2182 = vmatpush3.bf16.msra.mxu0 %v378_v3  ;;  %s2521_s21 = scalar_lea.vmem %s2915_s0, %s2086_s18  ;;  %v2542_v13 = vand.u32 127, %v333_v12  ;;  %v2551_v18 = vld [vmem:[%s2918_s3] ss:$0 sm:$0xff]  ;;  %v2431_v22 = vmov 0.5   ;;  %vm466_vm6 = vcmask 261120   ;;  %vm539_vm7 = vcmask 257024  }
   0xf   : > { %2193 = vmatprep.subr.bf16.mxu1 %v2428_v1  ;;  %2195 = vmatprep.mubr.msk.bf16.mxu1 %vm2429_vm1, %v2428_v1  ;;  %v339_v5 = vld [vmem:[%s2521_s21] sm:$0xff]  ;;  %v340_v6 = vld [vmem:[%s2521_s21 + $0x8] sm:$0xff]  ;;  %v341_v7 = vld [vmem:[%s2521_s21 + $0x10] sm:$0xff]  ;;  %s1905_s18 = sld [smem:[#allocation4]]  ;;  %vm1955_vm8 = vcmask 1041409   ;;  %vm1957_vm9 = vcmask 1042434  }
  0x10   : > { %2207 = vmatprep.subr.bf16.mxu0 %v2428_v1  ;;  %v353_v8 = vpack.c.bf16 %v340_v6, %v339_v5  ;;  %v342_v9 = vld [vmem:[%s2521_s21 + $0x18] sm:$0xff]  ;;  %vm335_vm3 = vcmp.ge.s32.totalorder %v2542_v13, 64  ;;  %vm336_vm4 = vcmp.lt.s32.totalorder %v2542_v13, 96  ;;  %v343_v56 = vld [vmem:[%s2521_s21 + $0x20] sm:$0xff]  ;;  %v344_v57 = vld [vmem:[%s2521_s21 + $0x28] sm:$0xff]  ;;  %vm1959_vm10 = vcmask 1043459  }
  0x11   : > { %v354_v11 = vpack.c.bf16 %v342_v9, %v341_v7  ;;  %vm337_vm5 = vmand %vm335_vm3, %vm336_vm4  ;;  %v345_v58 = vld [vmem:[%s2521_s21 + $0x30] sm:$0xff]  ;;  %v355_v59 = vpack.c.bf16 %v344_v57, %v343_v56  ;;  %v346_v60 = vld [vmem:[%s2521_s21 + $0x38] sm:$0xff]  ;;  %vm1961_vm11 = vcmask 1044484   ;;  %s2032_s19 = sshll.u32 %s2926_s12, 3  ;;  %vm1963_vm12 = vcmask 1045509  }
  0x12   : > { %2194 = vmatpush3.bf16.msra.mxu1 %v2508_v4  ;;  %2183 = vmatprep.mubr.msk.bf16.mxu0 %vm363_vm2, %v353_v8  ;;  %v2554_v23 = vsel %vm337_vm5, 1.0, %v2431_v22  ;;  %v356_v61 = vpack.c.bf16 %v346_v60, %v345_v58  ;;  %vm1965_vm13 = vcmask 1046534   ;;  %vm1967_vm14 = vcmask 1047559   ;;  %s331_s22 = scalar_lea.vmem %s2924_s9, %s2032_s19 }
  0x13   : > { %2199 = vmatprep.subr.bf16.mxu1 %v2428_v1  ;;  %2184 = vmatmul.mubr.msk.bf16.vlgmr.msra.gmra.mxu0 %vm363_vm2, %v354_v11  ;;  %vm1970_vm15 = vcmask 64512  }
  0x14   : > { %2208 = vmatpush3.bf16.msra.mxu0 %v2498_v0  ;;  %2187 = vmatprep.mubr.msk.bf16.mxu0 %vm363_vm2, %v355_v59 }
  0x15   : > { %2196 = vmatmul.mubr.bf16.vlgmr.msra.gmra.mxu1 %v2430_v10  ;;  %2209 = vmatprep.subr.bf16.mxu0 %v2428_v1 }
  0x16   : > { %2200 = vmatpush3.bf16.msra.mxu1 %v2498_v0  ;;  %2203 = vmatprep.mubr.msk.bf16.mxu1 %vm2429_vm1, %v2428_v1 }
  0x17   : > { %2201 = vmatprep.subr.bf16.mxu1 %v2428_v1 }
  0x18   : > { %2210 = vmatpush3.bf16.msra.mxu0 %v2508_v4 }
  0x19   : > { %2223 = vmatprep.subr.bf16.mxu0 %v2428_v1 }
  0x1a   : > { %2202 = vmatpush3.bf16.msra.mxu1 %v2508_v4 }
  0x1b   : > { %2215 = vmatprep.subr.bf16.mxu1 %v2428_v1  ;;  %2188 = vmatmul.mubr.msk.bf16.gmra.mxu0 %vm363_vm2, %v356_v61 }
  0x1c   : > { %2211 = vmatprep.mubr.msk.bf16.mxu0 %vm2429_vm1, %v2428_v1 }
  0xd3   : > { %v2546_v16 = vpop.f32.mrf.mxu0 }
  0xd4   : > { %v423_v11 = vadd.f32 %v2546_v16, %v2551_v18 }
  0xd5   : > { %v504_v14 = vpop.f32.mrf.mxu1  ;;  %v414_v19 = vpop.f32.mrf.mxu0 }
  0xd6   : > { %v415_v20 = vadd.f32 %v2551_v18, %v414_v19 }
  0xd7   : > { %v2197_v15 = vpop.f32.mrf.mxu1  ;;  %v2571_v39 = vpop.f32.mrf.mxu0 }
  0xd8   : > { %v510_v24 = vadd.f32 %v504_v14, %v415_v20 }
  0xd9   : > { %v507_v17 = vpop.f32.mrf.mxu1  ;;  %v417_v40 = vpop.f32.mrf.mxu0 }
  0xda   : > { %v511_v25 = vmul.f32 %v510_v24, %v2554_v23  ;;  %v418_v41 = vadd.f32 %v2551_v18, %v417_v40 }
  0xdb   : > { %v2198_v21 = vpop.f32.mrf.mxu1  ;;  %v2597_v6 = vpop.f32.mrf.mxu0 }
  0xdc   : > { %2356 = vtanh.f32 %v511_v25 }
  0xdd   : > { %v2599_v7 = vpop.f32.mrf.mxu0 }
  0xde   : > { %v431_v56 = vadd.f32 %v2551_v18, %v2599_v7 }
  0xdf   : > { %v2601_v8 = vpop.f32.mrf.mxu0 }
  0xe1   : > { %v2603_v9 = vpop.f32.mrf.mxu0 }
  0xe9   : > { %v2357_v26 = vpop.eup %2356 }
  0xea   : > { %517 = vrot.lane.b32.xlu0 %v2357_v26, %s2432_s24  ;;  %v513_v27 = vmul.f32 0.5, %v2357_v26 }
  0xec   : > { %v514_v28 = vadd.f32 0.5, %v513_v27 }
  0xee   : > { %v515_v31 = vmul.f32 0.0, %v514_v28 }
 0x15c   : > { %v518_v29 = vpop.permute.xlu0 %517 }
 0x15d   : > { %v520_v30 = vmul.f32 %v518_v29, %v514_v28 }
 0x15f   : > { %522 = vrot.lane.b32.xlu0 %v520_v30, %s2433_s25 }
 0x1d1   : > { %v523_v32 = vpop.permute.xlu0 %522 }
 0x1d2   : > { %v525_v33 = vadd.f32 %v523_v32, %v515_v31 }
 0x1d4   : > { %2358 = vtanh.f32 %v525_v33 }
 0x1e1   : > { %v2359_v34 = vpop.eup %2358 }
 0x1e2   : > { %528 = vrot.lane.b32.xlu1 %v2359_v34, %s2432_s24 }
 0x254   : > { %v529_v35 = vpop.permute.xlu1 %528 }
 0x255   : > { %v531_v36 = vmul.f32 %v529_v35, %v514_v28  ;;  %v426_v35 = vadd.f32 %v2571_v39, %v2551_v18 }
 0x257   : > { %v2560_v37 = vpack.c.bf16 %v531_v36, %v531_v36 }
 0x259   : > { %543 = vrot.lane.b32.xlu1 %v2560_v37, %s2433_s25 }
 0x2cb   : > { %v544_v38 = vpop.permute.xlu1 %543 }
 0x2cc   : > { %2204 = vmatmul.mubr.msk.bf16.vlgmr.msra.gmra.mxu1 %vm466_vm6, %v544_v38 }
 0x2cd   : > { %2216 = vmatpush3.bf16.msra.mxu1 %v2498_v0  ;;  %2219 = vmatprep.mubr.msk.bf16.mxu1 %vm2429_vm1, %v2428_v1 }
 0x2ce   : > { %2217 = vmatprep.subr.bf16.mxu1 %v2428_v1 }
 0x2d1   : > { %2218 = vmatpush3.bf16.msra.mxu1 %v2508_v4 }
 0x2d2   : > { %2231 = vmatprep.subr.bf16.mxu1 %v2428_v1 }
 0x38c   : > { %v582_v42 = vpop.f32.mrf.mxu1 }
 0x38d   : > { %v588_v43 = vadd.f32 %v582_v42, %v418_v41 }
 0x38e   : > { %v2205_v44 = vpop.f32.mrf.mxu1 }
 0x38f   : > { %v589_v45 = vmul.f32 %v588_v43, %v2554_v23 }
 0x390   : > { %v585_v46 = vpop.f32.mrf.mxu1 }
 0x391   : > { %2360 = vtanh.f32 %v589_v45 }
 0x392   : > { %v2206_v47 = vpop.f32.mrf.mxu1 }
 0x39e   : > { %v2361_v48 = vpop.eup %2360 }
 0x39f   : > { %595 = vrot.lane.b32.xlu0 %v2361_v48, %s2432_s24  ;;  %v591_v49 = vmul.f32 0.5, %v2361_v48 }
 0x3a1   : > { %v592_v50 = vadd.f32 0.5, %v591_v49 }
 0x3a3   : > { %v593_v53 = vmul.f32 %v592_v50, %v525_v33 }
 0x411   : > { %v596_v51 = vpop.permute.xlu0 %595 }
 0x412   : > { %v598_v52 = vmul.f32 %v596_v51, %v592_v50 }
 0x414   : > { %600 = vrot.lane.b32.xlu1 %v598_v52, %s2433_s25 }
 0x486   : > { %v601_v54 = vpop.permute.xlu1 %600 }
 0x487   : > { %v603_v55 = vadd.f32 %v601_v54, %v593_v53 }
 0x489   : > { %2362 = vtanh.f32 %v603_v55 }
 0x496   : > { %v2363_v62 = vpop.eup %2362 }
 0x497   : > { %606 = vrot.lane.b32.xlu0 %v2363_v62, %s2432_s24 }
 0x509   : > { %v607_v63 = vpop.permute.xlu0 %606 }
 0x50a   : > { %v609_v2 = vmul.f32 %v607_v63, %v592_v50 }
 0x50c   : > { %v2586_v3 = vpack.c.bf16 %v609_v2, %v609_v2 }
 0x50e   : > { %621 = vrot.lane.b32.xlu1 %v2586_v3, %s2433_s25 }
 0x580   : > { %v622_v5 = vpop.permute.xlu1 %621 }
 0x581   : > { %2212 = vmatmul.mubr.msk.bf16.vlgmr.msra.gmra.mxu0 %vm466_vm6, %v622_v5 }
 0x582   : > { %2224 = vmatpush3.bf16.msra.mxu0 %v2498_v0  ;;  %2227 = vmatprep.mubr.msk.bf16.mxu0 %vm2429_vm1, %v2428_v1 }
 0x583   : > { %2225 = vmatprep.subr.bf16.mxu0 %v2428_v1 }
 0x586   : > { %2226 = vmatpush3.bf16.msra.mxu0 %v2508_v4 }
 0x587   : > { %2239 = vmatprep.subr.bf16.mxu0 %v2428_v1 }
 0x641   : > { %v660_v14 = vpop.f32.mrf.mxu0 }
 0x642   : > { %v666_v15 = vadd.f32 %v660_v14, %v423_v11 }
 0x643   : > { %v2213_v17 = vpop.f32.mrf.mxu0 }
 0x644   : > { %v667_v19 = vmul.f32 %v666_v15, %v2554_v23 }
 0x645   : > { %v663_v20 = vpop.f32.mrf.mxu0 }
 0x646   : > { %2364 = vtanh.f32 %v667_v19 }
 0x647   : > { %v2214_v21 = vpop.f32.mrf.mxu0 }
 0x653   : > { %v2365_v22 = vpop.eup %2364 }
 0x654   : > { %673 = vrot.lane.b32.xlu0 %v2365_v22, %s2432_s24  ;;  %v669_v24 = vmul.f32 0.5, %v2365_v22 }
 0x656   : > { %v670_v25 = vadd.f32 0.5, %v669_v24 }
 0x658   : > { %v671_v28 = vmul.f32 %v670_v25, %v603_v55 }
 0x6c6   : > { %v674_v26 = vpop.permute.xlu0 %673 }
 0x6c7   : > { %v676_v27 = vmul.f32 %v674_v26, %v670_v25 }
 0x6c9   : > { %678 = vrot.lane.b32.xlu1 %v676_v27, %s2433_s25 }
 0x73b   : > { %v679_v29 = vpop.permute.xlu1 %678 }
 0x73c   : > { %v681_v16 = vadd.f32 %v679_v29, %v671_v28 }
 0x73e   : > { %2366 = vtanh.f32 %v681_v16 }
 0x74b   : > { %v2367_v30 = vpop.eup %2366 }
 0x74c   : > { %684 = vrot.lane.b32.xlu0 %v2367_v30, %s2432_s24 }
 0x7be   : > { %v685_v31 = vpop.permute.xlu0 %684 }
 0x7bf   : > { %v687_v32 = vmul.f32 %v685_v31, %v670_v25  ;;  %v434_v25 = vadd.f32 %v2551_v18, %v2603_v9 }
 0x7c1   : > { %v2611_v33 = vpack.c.bf16 %v687_v32, %v687_v32 }
 0x7c3   : > { %699 = vrot.lane.b32.xlu1 %v2611_v33, %s2433_s25 }
 0x835   : > { %v700_v34 = vpop.permute.xlu1 %699 }
 0x836   : > { %2220 = vmatmul.mubr.msk.bf16.vlgmr.msra.gmra.mxu1 %vm466_vm6, %v700_v34 }
 0x837   : > { %2232 = vmatpush3.bf16.msra.mxu1 %v2498_v0  ;;  %2235 = vmatprep.mubr.msk.bf16.mxu1 %vm2429_vm1, %v2428_v1 }
 0x838   : > { %2233 = vmatprep.subr.bf16.mxu1 %v2428_v1 }
 0x83b   : > { %2234 = vmatpush3.bf16.msra.mxu1 %v2508_v4 }
 0x83c   : > { %2247 = vmatprep.subr.bf16.mxu1 %v2428_v1 }
 0x8f6   : > { %v738_v36 = vpop.f32.mrf.mxu1 }
 0x8f7   : > { %v744_v38 = vadd.f32 %v738_v36, %v426_v35 }
 0x8f8   : > { %v2221_v40 = vpop.f32.mrf.mxu1 }
 0x8f9   : > { %v745_v41 = vmul.f32 %v744_v38, %v2554_v23 }
 0x8fa   : > { %v741_v42 = vpop.f32.mrf.mxu1 }
 0x8fb   : > { %2368 = vtanh.f32 %v745_v41 }
 0x8fc   : > { %v2222_v43 = vpop.f32.mrf.mxu1 }
 0x908   : > { %v2369_v44 = vpop.eup %2368 }
 0x909   : > { %751 = vrot.lane.b32.xlu0 %v2369_v44, %s2432_s24  ;;  %v747_v45 = vmul.f32 0.5, %v2369_v44  ;;  %v439_v44 = vadd.f32 %v2597_v6, %v2551_v18 }
 0x90b   : > { %v748_v46 = vadd.f32 0.5, %v747_v45 }
 0x90d   : > { %v749_v49 = vmul.f32 %v748_v46, %v681_v16 }
 0x97b   : > { %v752_v47 = vpop.permute.xlu0 %751 }
 0x97c   : > { %v754_v48 = vmul.f32 %v752_v47, %v748_v46 }
 0x97e   : > { %756 = vrot.lane.b32.xlu1 %v754_v48, %s2433_s25 }
 0x9f0   : > { %v757_v50 = vpop.permute.xlu1 %756 }
 0x9f1   : > { %v759_v39 = vadd.f32 %v757_v50, %v749_v49 }
 0x9f3   : > { %2370 = vtanh.f32 %v759_v39 }
 0xa00   : > { %v2371_v51 = vpop.eup %2370 }
 0xa01   : > { %762 = vrot.lane.b32.xlu0 %v2371_v51, %s2432_s24 }
 0xa73   : > { %v763_v52 = vpop.permute.xlu0 %762 }
 0xa74   : > { %v765_v53 = vmul.f32 %v763_v52, %v748_v46 }
 0xa76   : > { %v2628_v54 = vpack.c.bf16 %v765_v53, %v765_v53 }
 0xa78   : > { %777 = vrot.lane.b32.xlu1 %v2628_v54, %s2433_s25 }
 0xaea   : > { %v778_v55 = vpop.permute.xlu1 %777 }
 0xaeb   : > { %2228 = vmatmul.mubr.msk.bf16.vlgmr.msra.gmra.mxu0 %vm466_vm6, %v778_v55 }
 0xaec   : > { %2240 = vmatpush3.bf16.msra.mxu0 %v2498_v0  ;;  %2243 = vmatprep.mubr.msk.bf16.mxu0 %vm2429_vm1, %v2428_v1 }
 0xaed   : > { %2241 = vmatprep.subr.bf16.mxu0 %v2428_v1 }
 0xaf0   : > { %2242 = vmatpush3.bf16.msra.mxu0 %v2508_v4 }
 0xbab   : > { %v816_v57 = vpop.f32.mrf.mxu0 }
 0xbac   : > { %v822_v58 = vadd.f32 %v816_v57, %v431_v56 }
 0xbad   : > { %v2229_v59 = vpop.f32.mrf.mxu0 }
 0xbae   : > { %v823_v60 = vmul.f32 %v822_v58, %v2554_v23 }
 0xbaf   : > { %v819_v61 = vpop.f32.mrf.mxu0 }
 0xbb0   : > { %2372 = vtanh.f32 %v823_v60 }
 0xbb1   : > { %v2230_v62 = vpop.f32.mrf.mxu0 }
 0xbbd   : > { %v2373_v63 = vpop.eup %2372 }
 0xbbe   : > { %829 = vrot.lane.b32.xlu0 %v2373_v63, %s2432_s24  ;;  %v825_v2 = vmul.f32 0.5, %v2373_v63 }
 0xbc0   : > { %v826_v5 = vadd.f32 0.5, %v825_v2 }
 0xbc2   : > { %v827_v15 = vmul.f32 %v826_v5, %v759_v39 }
 0xc30   : > { %v830_v11 = vpop.permute.xlu0 %829 }
 0xc31   : > { %v832_v14 = vmul.f32 %v830_v11, %v826_v5 }
 0xc33   : > { %834 = vrot.lane.b32.xlu1 %v832_v14, %s2433_s25  ;;  %v2710_v14 = vld [vmem:[%s2920_s5] sm:$0xff]  }
 0xca5   : > { %v835_v17 = vpop.permute.xlu1 %834 }
 0xca6   : > { %v837_v7 = vadd.f32 %v835_v17, %v827_v15  ;;  %v442_v17 = vadd.f32 %v2601_v8, %v2551_v18 }
 0xca8   : > { %2374 = vtanh.f32 %v837_v7 }
 0xcb5   : > { %v2375_v19 = vpop.eup %2374 }
 0xcb6   : > { %840 = vrot.lane.b32.xlu0 %v2375_v19, %s2432_s24 }
 0xd28   : > { %v841_v20 = vpop.permute.xlu0 %840 }
 0xd29   : > { %v843_v21 = vmul.f32 %v841_v20, %v826_v5 }
 0xd2b   : > { %v2644_v22 = vpack.c.bf16 %v843_v21, %v843_v21 }
 0xd2d   : > { %855 = vrot.lane.b32.xlu1 %v2644_v22, %s2433_s25 }
 0xd9f   : > { %v856_v24 = vpop.permute.xlu1 %855 }
 0xda0   : > { %2236 = vmatmul.mubr.msk.bf16.vlgmr.msra.gmra.mxu1 %vm466_vm6, %v856_v24 }
 0xda1   : > { %2248 = vmatpush3.bf16.msra.mxu1 %v2498_v0  ;;  %2251 = vmatprep.mubr.msk.bf16.mxu1 %vm2429_vm1, %v2428_v1 }
 0xda2   : > { %2249 = vmatprep.subr.bf16.mxu1 %v2428_v1 }
 0xda5   : > { %2250 = vmatpush3.bf16.msra.mxu1 %v2508_v4 }
 0xda6   : > { %2267 = vmatprep.subr.bf16.mxu1 %v2428_v1 }
 0xe60   : > { %v894_v26 = vpop.f32.mrf.mxu1 }
 0xe61   : > { %v900_v27 = vadd.f32 %v894_v26, %v434_v25  ;;  %v2735_v25 = vld [vmem:[%s2921_s6] ss:$0 sm:$0xff] }
 0xe62   : > { %v2237_v28 = vpop.f32.mrf.mxu1 }
 0xe63   : > { %v901_v29 = vmul.f32 %v900_v27, %v2554_v23 }
 0xe64   : > { %v897_v16 = vpop.f32.mrf.mxu1 }
 0xe65   : > { %2376 = vtanh.f32 %v901_v29 }
 0xe66   : > { %v2238_v0 = vpop.f32.mrf.mxu1 }
 0xe72   : > { %v2377_v30 = vpop.eup %2376 }
 0xe73   : > { %907 = vrot.lane.b32.xlu0 %v2377_v30, %s2432_s24  ;;  %v903_v31 = vmul.f32 0.5, %v2377_v30 }
 0xe75   : > { %v904_v32 = vadd.f32 0.5, %v903_v31 }
 0xe77   : > { %v905_v35 = vmul.f32 %v904_v32, %v837_v7 }
 0xee5   : > { %v908_v34 = vpop.permute.xlu0 %907 }
 0xee6   : > { %v910_v4 = vmul.f32 %v908_v34, %v904_v32 }
 0xee8   : > { %912 = vrot.lane.b32.xlu1 %v910_v4, %s2433_s25 }
 0xf5a   : > { %v913_v36 = vpop.permute.xlu1 %912 }
 0xf5b   : > { %v915_v9 = vadd.f32 %v913_v36, %v905_v35 }
 0xf5d   : > { %2378 = vtanh.f32 %v915_v9 }
 0xf6a   : > { %v2379_v38 = vpop.eup %2378 }
 0xf6b   : > { %918 = vrot.lane.b32.xlu0 %v2379_v38, %s2432_s24 }
 0xfdd   : > { %v919_v40 = vpop.permute.xlu0 %918 }
 0xfde   : > { %v921_v41 = vmul.f32 %v919_v40, %v904_v32 }
 0xfe0   : > { %v2661_v42 = vpack.c.bf16 %v921_v41, %v921_v41 }
 0xfe2   : > { %933 = vrot.lane.b32.xlu1 %v2661_v42, %s2433_s25 }
0x1054   : > { %v934_v43 = vpop.permute.xlu1 %933 }
0x1055   : > { %2244 = vmatmul.mubr.msk.bf16.vlgmr.msra.gmra.mxu0 %vm466_vm6, %v934_v43 }
0x1115   : > { %v972_v45 = vpop.f32.mrf.mxu0 }
0x1116   : > { %v978_v46 = vadd.f32 %v972_v45, %v439_v44 }
0x1117   : > { %v2245_v47 = vpop.f32.mrf.mxu0 }
0x1118   : > { %v979_v48 = vmul.f32 %v978_v46, %v2554_v23 }
0x1119   : > { %v975_v49 = vpop.f32.mrf.mxu0 }
0x111a   : > { %2380 = vtanh.f32 %v979_v48 }
0x111b   : > { %v2246_v50 = vpop.f32.mrf.mxu0 }
0x1127   : > { %v2381_v39 = vpop.eup %2380 }
0x1128   : > { %985 = vrot.lane.b32.xlu0 %v2381_v39, %s2432_s24  ;;  %v981_v51 = vmul.f32 0.5, %v2381_v39 }
0x112a   : > { %v982_v52 = vadd.f32 0.5, %v981_v51 }
0x112c   : > { %v983_v6 = vmul.f32 %v982_v52, %v915_v9 }
0x119a   : > { %v986_v53 = vpop.permute.xlu0 %985 }
0x119b   : > { %v988_v55 = vmul.f32 %v986_v53, %v982_v52 }
0x119d   : > { %990 = vrot.lane.b32.xlu1 %v988_v55, %s2433_s25 }
0x11a1   : > { %536 = vrot.lane.b32.xlu1 %v2560_v37, %s2433_s25  ;;  %v2348_v37 = vld [vmem:[%s2919_s4 + $0x8] sm:$0xff]  }
0x11a2   : > { %2255 = vmatprep.subr.bf16.mxu0 %v2348_v37 }
0x11a3   : > { %2256 = vmatpush3.bf16.msra.mxu0 %v2348_v37 }
0x11a5   : > { %692 = vrot.lane.b32.xlu1 %v2611_v33, %s2433_s25  ;;  %v2349_v33 = vld [vmem:[%s2919_s4] sm:$0xff]  }
0x11a6   : > { %2257 = vmatprep.subr.bf16.mxu0 %v2349_v33 }
0x11a7   : > { %2258 = vmatpush3.bf16.msra.mxu0 %v2349_v33 }
0x11a8   : > { %2283 = vmatprep.subr.bf16.mxu0 %v2428_v1 }
0x120f   : > { %v991_v56 = vpop.permute.xlu1 %990 }
0x1210   : > { %v2675_v57 = vadd.f32 %v991_v56, %v983_v6 }
0x1212   : > { %2382 = vtanh.f32 %v2675_v57 }
0x1213   : > { %v537_v58 = vpop.permute.xlu1 %536 }
0x1214   : > { %540 = vst.msk [vmem:[#allocation3] sm:$0xf] %vm539_vm7, %v537_v58 }
0x1217   : > { %v693_v59 = vpop.permute.xlu1 %692 }
0x1218   : > { %696 = vst.msk [vmem:[#allocation3 + $0x8] sm:$0xf] %vm539_vm7, %v693_v59 }
0x121f   : > { %v2383_v60 = vpop.eup %2382 }
0x1220   : > { %996 = vrot.lane.b32.xlu0 %v2383_v60, %s2432_s24 }
0x1224   : > { %614 = vrot.lane.b32.xlu0 %v2586_v3, %s2433_s25 }
0x1228   : > { %770 = vrot.lane.b32.xlu0 %v2628_v54, %s2433_s25  ;;  %v2702_v54 = vld [vmem:[%s2920_s5 + $0x8] sm:$0xff]  }
0x1292   : > { %v997_v61 = vpop.permute.xlu0 %996 }
0x1293   : > { %v999_v62 = vmul.f32 %v997_v61, %v982_v52 }
0x1295   : > { %v2692_v63 = vpack.c.bf16 %v999_v62, %v999_v62 }
0x1296   : > { %v615_v2 = vpop.permute.xlu0 %614 }
0x1297   : > { %618 = vst.msk [vmem:[#allocation3 + $0x4] sm:$0xf] %vm539_vm7, %v615_v2  ;;  %1011 = vrot.lane.b32.xlu1 %v2692_v63, %s2433_s25 }
0x129a   : > { %v771_v5 = vpop.permute.xlu0 %770 }
0x129b   : > { %774 = vst.msk [vmem:[#allocation3 + $0xc] sm:$0xf] %vm539_vm7, %v771_v5 }
0x129e   : > { %v2350_v11 = vld [vmem:[#allocation3] sm:$0xff]  }
0x129f   : > { %2259 = vmatprep.mubr.msk.bf16.mxu0 %vm466_vm6, %v2350_v11 }
0x12a2   : > { %v2351_v3 = vld [vmem:[#allocation3 + $0x8] sm:$0xff]  }
0x12a3   : > { %2260 = vmatmul.mubr.msk.bf16.vlgmr.msra.gmra.mxu0 %vm466_vm6, %v2351_v3 }
0x12a4   : > { %2284 = vmatpush3.bf16.msra.mxu0 %v2702_v54 }
0x12a5   : > { %2285 = vmatprep.subr.bf16.mxu0 %v2428_v1 }
0x12a8   : > { %2286 = vmatpush3.bf16.msra.mxu0 %v2710_v14 }
0x12a9   : > { %2299 = vmatprep.subr.bf16.mxu0 %v2428_v1 }
0x1309   : > { %v1012_v15 = vpop.permute.xlu1 %1011 }
0x130a   : > { %2252 = vmatmul.mubr.msk.bf16.vlgmr.msra.gmra.mxu1 %vm466_vm6, %v1012_v15 }
0x130b   : > { %2268 = vmatpush3.bf16.msra.mxu1 %v2702_v54  ;;  %2271 = vmatprep.mubr.msk.bf16.mxu1 %vm2429_vm1, %v2428_v1 }
0x130c   : > { %2269 = vmatprep.subr.bf16.mxu1 %v2428_v1 }
0x130f   : > { %2270 = vmatpush3.bf16.msra.mxu1 %v2710_v14 }
0x1310   : > { %2275 = vmatprep.subr.bf16.mxu1 %v2428_v1 }
0x1312   : > { %2272 = vmatmul.mubr.bf16.vlgmr.msra.gmra.mxu1 %v2430_v10 }
0x1313   : > { %2276 = vmatpush3.bf16.msra.mxu1 %v2702_v54  ;;  %2279 = vmatprep.mubr.msk.bf16.mxu1 %vm2429_vm1, %v2428_v1 }
0x1314   : > { %2277 = vmatprep.subr.bf16.mxu1 %v2428_v1 }
0x1317   : > { %2278 = vmatpush3.bf16.msra.mxu1 %v2710_v14 }
0x1318   : > { %2291 = vmatprep.subr.bf16.mxu1 %v2428_v1 }
0x1363   : > { %v2730_v7 = vpop.f32.mrf.mxu0 }
0x1365   : > { %v1188_v10 = vpop.f32.mrf.mxu0 }
0x1366   : > { %v1189_v27 = vadd.f32 %v2735_v25, %v1188_v10 }
0x13ca   : > { %v1050_v19 = vpop.f32.mrf.mxu1 }
0x13cb   : > { %v1056_v20 = vadd.f32 %v1050_v19, %v442_v17 }
0x13cc   : > { %v2253_v21 = vpop.f32.mrf.mxu1 }
0x13cd   : > { %v1057_v38 = vmul.f32 %v1056_v20, %v2554_v23 }
0x13ce   : > { %v1053_v24 = vpop.f32.mrf.mxu1 }
0x13d0   : > { %v2254_v26 = vpop.f32.mrf.mxu1 }
0x13d2   : > { %v1274_v28 = vpop.f32.mrf.mxu1 }
0x13d3   : > { %v1280_v29 = vadd.f32 %v1274_v28, %v1189_v27 }
0x13d4   : > { %v2273_v16 = vpop.f32.mrf.mxu1 }
0x13d5   : > { %v1281_v18 = vmul.f32 %v1280_v29, %v2554_v23 }
0x13d6   : > { %v1277_v8 = vpop.f32.mrf.mxu1 }
0x13d7   : > { %2384 = vtanh.f32 %v1281_v18 }
0x13d8   : > { %v2274_v0 = vpop.f32.mrf.mxu1 }
0x13e4   : > { %v2385_v30 = vpop.eup %2384 }
0x13e5   : > { %1287 = vrot.lane.b32.xlu0 %v2385_v30, %s2432_s24  ;;  %v1283_v31 = vmul.f32 0.5, %v2385_v30 }
0x13e7   : > { %v1284_v32 = vadd.f32 0.5, %v1283_v31 }
0x13e9   : > { %v1285_v35 = vmul.f32 0.0, %v1284_v32 }
0x1457   : > { %v1288_v34 = vpop.permute.xlu0 %1287 }
0x1458   : > { %v1290_v4 = vmul.f32 %v1288_v34, %v1284_v32 }
0x145a   : > { %1292 = vrot.lane.b32.xlu1 %v1290_v4, %s2433_s25 }
0x14cc   : > { %v1293_v36 = vpop.permute.xlu1 %1292 }
0x14cd   : > { %v1295_v9 = vadd.f32 %v1293_v36, %v1285_v35 }
0x14cf   : > { %2386 = vtanh.f32 %v1295_v9 }
0x14d0   : > { %2388 = vtanh.f32 %v1057_v38 }
0x14dc   : > { %v2387_v40 = vpop.eup %2386 }
0x14dd   : > { %1298 = vrot.lane.b32.xlu0 %v2387_v40, %s2432_s24  ;;  %v2389_v41 = vpop.eup %2388 }
0x14de   : > { %v1059_v43 = vmul.f32 0.5, %v2389_v41 }
0x14e0   : > { %v1060_v47 = vadd.f32 0.5, %v1059_v43 }
0x14e1   : > { %1063 = vrot.lane.b32.xlu0 %v2389_v41, %s2432_s24 }
0x14e2   : > { %v1061_v39 = vmul.f32 %v1060_v47, %v2675_v57  ;;  %v2764_v57 = vpop.f32.mrf.mxu0 }
0x14e4   : > { %v1191_v58 = vpop.f32.mrf.mxu0 }
0x14e5   : > { %v1192_v59 = vadd.f32 %v2735_v25, %v1191_v58 }
0x154f   : > { %v1299_v44 = vpop.permute.xlu0 %1298 }
0x1550   : > { %v1301_v45 = vmul.f32 %v1299_v44, %v1284_v32  ;;  %v1197_v32 = vadd.f32 %v2730_v7, %v2735_v25 }
0x1552   : > { %v2744_v46 = vpack.c.bf16 %v1301_v45, %v1301_v45 }
0x1553   : > { %v1064_v48 = vpop.permute.xlu0 %1063 }
0x1554   : > { %v1066_v49 = vmul.f32 %v1064_v48, %v1060_v47  ;;  %1311 = vrot.lane.b32.xlu1 %v2744_v46, %s2433_s25 }
0x1556   : > { %1068 = vrot.lane.b32.xlu0 %v1066_v49, %s2433_s25 }
0x15c6   : > { %v1312_v50 = vpop.permute.xlu1 %1311 }
0x15c7   : > { %2280 = vmatmul.mubr.msk.bf16.vlgmr.msra.gmra.mxu1 %vm466_vm6, %v1312_v50 }
0x15c8   : > { %v1069_v51 = vpop.permute.xlu0 %1068  ;;  %2292 = vmatpush3.bf16.msra.mxu1 %v2702_v54  ;;  %2295 = vmatprep.mubr.msk.bf16.mxu1 %vm2429_vm1, %v2428_v1 }
0x15c9   : > { %v1071_v52 = vadd.f32 %v1069_v51, %v1061_v39  ;;  %2293 = vmatprep.subr.bf16.mxu1 %v2428_v1 }
0x15cb   : > { %2390 = vtanh.f32 %v1071_v52 }
0x15cc   : > { %2294 = vmatpush3.bf16.msra.mxu1 %v2710_v14 }
0x15cd   : > { %2307 = vmatprep.subr.bf16.mxu1 %v2428_v1 }
0x15d8   : > { %v2391_v53 = vpop.eup %2390 }
0x15d9   : > { %1074 = vrot.lane.b32.xlu0 %v2391_v53, %s2432_s24  ;;  %v1200_v53 = vadd.f32 %v2764_v57, %v2735_v25 }
0x15dd   : > { %848 = vrot.lane.b32.xlu0 %v2644_v22, %s2433_s25 }
0x15e1   : > { %1004 = vrot.lane.b32.xlu0 %v2692_v63, %s2433_s25 }
0x164b   : > { %v1075_v55 = vpop.permute.xlu0 %1074 }
0x164c   : > { %v1077_v21 = vmul.f32 %v1075_v55, %v1060_v47 }
0x164e   : > { %v2094_v10 = vpack.c.bf16 %v1077_v21, %v1077_v21 }
0x164f   : > { %v849_v6 = vpop.permute.xlu0 %848 }
0x1650   : > { %852 = vst.msk [vmem:[#allocation3 + $0x10] sm:$0xf] %vm539_vm7, %v849_v6 }
0x1653   : > { %v1005_v56 = vpop.permute.xlu0 %1004 }
0x1654   : > { %1008 = vst.msk [vmem:[#allocation3 + $0x18] sm:$0xf] %vm539_vm7, %v1005_v56 }
0x1687   : > { %v1350_v37 = vpop.f32.mrf.mxu1 }
0x1688   : > { %v1356_v33 = vadd.f32 %v1350_v37, %v1192_v59 }
0x1689   : > { %v2281_v60 = vpop.f32.mrf.mxu1 }
0x168a   : > { %v1357_v22 = vmul.f32 %v1356_v33, %v2554_v23 }
0x168b   : > { %v1353_v61 = vpop.f32.mrf.mxu1 }
0x168c   : > { %2392 = vtanh.f32 %v1357_v22 }
0x168d   : > { %v2282_v62 = vpop.f32.mrf.mxu1 }
0x1699   : > { %v2393_v63 = vpop.eup %2392 }
0x169a   : > { %1363 = vrot.lane.b32.xlu1 %v2393_v63, %s2432_s24  ;;  %v1359_v2 = vmul.f32 0.5, %v2393_v63 }
0x169c   : > { %v1360_v5 = vadd.f32 0.5, %v1359_v2 }
0x169e   : > { %v1361_v15 = vmul.f32 %v1360_v5, %v1295_v9 }
0x170c   : > { %v1364_v11 = vpop.permute.xlu1 %1363 }
0x170d   : > { %v1366_v3 = vmul.f32 %v1364_v11, %v1360_v5 }
0x170f   : > { %1368 = vrot.lane.b32.xlu1 %v1366_v3, %s2433_s25 }
0x1781   : > { %v1369_v17 = vpop.permute.xlu1 %1368 }
0x1782   : > { %v1371_v19 = vadd.f32 %v1369_v17, %v1361_v15 }
0x1784   : > { %2394 = vtanh.f32 %v1371_v19 }
0x1791   : > { %v2395_v20 = vpop.eup %2394 }
0x1792   : > { %1374 = vrot.lane.b32.xlu1 %v2395_v20, %s2432_s24 }
0x1796   : > { %926 = vrot.lane.b32.xlu1 %v2661_v42, %s2433_s25 }
0x179a   : > { %1082 = vrot.lane.b32.xlu1 %v2094_v10, %s2433_s25 }
0x1804   : > { %v1375_v24 = vpop.permute.xlu1 %1374 }
0x1805   : > { %v1377_v26 = vmul.f32 %v1375_v24, %v1360_v5 }
0x1807   : > { %v2774_v27 = vpack.c.bf16 %v1377_v26, %v1377_v26 }
0x1808   : > { %v927_v28 = vpop.permute.xlu1 %926 }
0x1809   : > { %930 = vst.msk [vmem:[#allocation3 + $0x14] sm:$0xf] %vm539_vm7, %v927_v28  ;;  %1387 = vrot.lane.b32.xlu0 %v2774_v27, %s2433_s25 }
0x180c   : > { %v1083_v29 = vpop.permute.xlu1 %1082 }
0x180d   : > { %1086 = vst.msk [vmem:[#allocation3 + $0x1c] sm:$0xf] %vm539_vm7, %v1083_v29 }
0x1810   : > { %v2354_v16 = vld [vmem:[#allocation3 + $0x10] sm:$0xff]  }
0x1811   : > { %2263 = vmatprep.mubr.msk.bf16.mxu0 %vm466_vm6, %v2354_v16 }
0x1814   : > { %v2355_v42 = vld [vmem:[#allocation3 + $0x18] sm:$0xff]  }
0x1815   : > { %2264 = vmatmul.mubr.msk.bf16.gmra.mxu0 %vm466_vm6, %v2355_v42 }
0x1816   : > { %2287 = vmatprep.mubr.msk.bf16.mxu0 %vm2429_vm1, %v2428_v1 }
0x187b   : > { %v1388_v18 = vpop.permute.xlu0 %1387 }
0x187c   : > { %2288 = vmatmul.mubr.msk.bf16.vlgmr.msra.gmra.mxu0 %vm466_vm6, %v1388_v18 }
0x187d   : > { %2300 = vmatpush3.bf16.msra.mxu0 %v2702_v54  ;;  %2303 = vmatprep.mubr.msk.bf16.mxu0 %vm2429_vm1, %v2428_v1 }
0x187e   : > { %2301 = vmatprep.subr.bf16.mxu0 %v2428_v1 }
0x1881   : > { %2302 = vmatpush3.bf16.msra.mxu0 %v2710_v14 }
0x1882   : > { %2315 = vmatprep.subr.bf16.mxu0 %v2428_v1 }
0x18d5   : > { %v2791_v8 = vpop.f32.mrf.mxu0 }
0x18d7   : > { %v2793_v0 = vpop.f32.mrf.mxu0 }
0x18d9   : > { %v2795_v30 = vpop.f32.mrf.mxu0 }
0x18db   : > { %v2797_v31 = vpop.f32.mrf.mxu0 }
0x193c   : > { %v1426_v34 = vpop.f32.mrf.mxu0 }
0x193d   : > { %v1432_v4 = vadd.f32 %v1426_v34, %v1197_v32 }
0x193e   : > { %v2289_v35 = vpop.f32.mrf.mxu0 }
0x193f   : > { %v1433_v36 = vmul.f32 %v1432_v4, %v2554_v23 }
0x1940   : > { %v1429_v9 = vpop.f32.mrf.mxu0 }
0x1941   : > { %2396 = vtanh.f32 %v1433_v36 }
0x1942   : > { %v2290_v38 = vpop.f32.mrf.mxu0 }
0x194e   : > { %v2397_v40 = vpop.eup %2396 }
0x194f   : > { %1439 = vrot.lane.b32.xlu1 %v2397_v40, %s2432_s24  ;;  %v1435_v41 = vmul.f32 0.5, %v2397_v40 }
0x1951   : > { %v1436_v43 = vadd.f32 0.5, %v1435_v41  ;;  %v1208_v41 = vadd.f32 %v2735_v25, %v2797_v31 }
0x1953   : > { %v1437_v47 = vmul.f32 %v1436_v43, %v1371_v19  ;;  %v1205_v19 = vadd.f32 %v2735_v25, %v2793_v0 }
0x19c1   : > { %v1440_v44 = vpop.permute.xlu1 %1439 }
0x19c2   : > { %v1442_v45 = vmul.f32 %v1440_v44, %v1436_v43 }
0x19c4   : > { %1444 = vrot.lane.b32.xlu0 %v1442_v45, %s2433_s25 }
0x1a36   : > { %v1445_v48 = vpop.permute.xlu0 %1444 }
0x1a37   : > { %v1447_v7 = vadd.f32 %v1445_v48, %v1437_v47 }
0x1a39   : > { %2398 = vtanh.f32 %v1447_v7 }
0x1a46   : > { %v2399_v49 = vpop.eup %2398 }
0x1a47   : > { %1450 = vrot.lane.b32.xlu1 %v2399_v49, %s2432_s24 }
0x1ab9   : > { %v1451_v50 = vpop.permute.xlu1 %1450 }
0x1aba   : > { %v1453_v39 = vmul.f32 %v1451_v50, %v1436_v43 }
0x1abc   : > { %v2805_v51 = vpack.c.bf16 %v1453_v39, %v1453_v39 }
0x1abe   : > { %1463 = vrot.lane.b32.xlu0 %v2805_v51, %s2433_s25 }
0x1b30   : > { %v1464_v52 = vpop.permute.xlu0 %1463 }
0x1b31   : > { %2296 = vmatmul.mubr.msk.bf16.vlgmr.msra.gmra.mxu1 %vm466_vm6, %v1464_v52 }
0x1b32   : > { %2308 = vmatpush3.bf16.msra.mxu1 %v2702_v54  ;;  %2311 = vmatprep.mubr.msk.bf16.mxu1 %vm2429_vm1, %v2428_v1 }
0x1b33   : > { %2309 = vmatprep.subr.bf16.mxu1 %v2428_v1 }
0x1b36   : > { %2310 = vmatpush3.bf16.msra.mxu1 %v2710_v14 }
0x1b37   : > { %2323 = vmatprep.subr.bf16.mxu1 %v2428_v1 }
0x1bf1   : > { %v1502_v55 = vpop.f32.mrf.mxu1 }
0x1bf2   : > { %v1508_v6 = vadd.f32 %v1502_v55, %v1200_v53 }
0x1bf3   : > { %v2297_v56 = vpop.f32.mrf.mxu1 }
0x1bf4   : > { %v1509_v58 = vmul.f32 %v1508_v6, %v2554_v23 }
0x1bf5   : > { %v1505_v59 = vpop.f32.mrf.mxu1 }
0x1bf6   : > { %2400 = vtanh.f32 %v1509_v58  ;;  %v1213_v59 = vadd.f32 %v2791_v8, %v2735_v25 }
0x1bf7   : > { %v2298_v37 = vpop.f32.mrf.mxu1 }
0x1c03   : > { %v2401_v33 = vpop.eup %2400 }
0x1c04   : > { %1515 = vrot.lane.b32.xlu1 %v2401_v33, %s2432_s24  ;;  %v1511_v60 = vmul.f32 0.5, %v2401_v33 }
0x1c06   : > { %v1512_v22 = vadd.f32 0.5, %v1511_v60 }
0x1c08   : > { %v1513_v63 = vmul.f32 %v1512_v22, %v1447_v7 }
0x1c76   : > { %v1516_v61 = vpop.permute.xlu1 %1515 }
0x1c77   : > { %v1518_v62 = vmul.f32 %v1516_v61, %v1512_v22 }
0x1c79   : > { %1520 = vrot.lane.b32.xlu0 %v1518_v62, %s2433_s25 }
0x1ceb   : > { %v1521_v2 = vpop.permute.xlu0 %1520 }
0x1cec   : > { %v1523_v57 = vadd.f32 %v1521_v2, %v1513_v63 }
0x1cee   : > { %2402 = vtanh.f32 %v1523_v57 }
0x1cfb   : > { %v2403_v5 = vpop.eup %2402 }
0x1cfc   : > { %1526 = vrot.lane.b32.xlu1 %v2403_v5, %s2432_s24 }
0x1d6e   : > { %v1527_v11 = vpop.permute.xlu1 %1526 }
0x1d6f   : > { %v1529_v3 = vmul.f32 %v1527_v11, %v1512_v22 }
0x1d71   : > { %v2822_v15 = vpack.c.bf16 %v1529_v3, %v1529_v3 }
0x1d73   : > { %1539 = vrot.lane.b32.xlu0 %v2822_v15, %s2433_s25 }
0x1de5   : > { %v1540_v17 = vpop.permute.xlu0 %1539 }
0x1de6   : > { %2304 = vmatmul.mubr.msk.bf16.vlgmr.msra.gmra.mxu0 %vm466_vm6, %v1540_v17 }
0x1de7   : > { %2316 = vmatpush3.bf16.msra.mxu0 %v2702_v54  ;;  %2319 = vmatprep.mubr.msk.bf16.mxu0 %vm2429_vm1, %v2428_v1 }
0x1de8   : > { %2317 = vmatprep.subr.bf16.mxu0 %v2428_v1 }
0x1deb   : > { %2318 = vmatpush3.bf16.msra.mxu0 %v2710_v14 }
0x1ea6   : > { %v1578_v20 = vpop.f32.mrf.mxu0 }
0x1ea7   : > { %v1584_v21 = vadd.f32 %v1578_v20, %v1205_v19 }
0x1ea8   : > { %v2305_v10 = vpop.f32.mrf.mxu0 }
0x1ea9   : > { %v1585_v24 = vmul.f32 %v1584_v21, %v2554_v23 }
0x1eaa   : > { %v1581_v26 = vpop.f32.mrf.mxu0 }
0x1eab   : > { %2404 = vtanh.f32 %v1585_v24  ;;  %v1216_v26 = vadd.f32 %v2795_v30, %v2735_v25 }
0x1eac   : > { %v2306_v28 = vpop.f32.mrf.mxu0 }
0x1eb8   : > { %v2405_v29 = vpop.eup %2404 }
0x1eb9   : > { %1591 = vrot.lane.b32.xlu1 %v2405_v29, %s2432_s24  ;;  %v1587_v16 = vmul.f32 0.5, %v2405_v29 }
0x1ebb   : > { %v1588_v42 = vadd.f32 0.5, %v1587_v16 }
0x1ebd   : > { %v1589_v34 = vmul.f32 %v1588_v42, %v1523_v57 }
0x1f2b   : > { %v1592_v18 = vpop.permute.xlu1 %1591 }
0x1f2c   : > { %v1594_v32 = vmul.f32 %v1592_v18, %v1588_v42 }
0x1f2e   : > { %1596 = vrot.lane.b32.xlu0 %v1594_v32, %s2433_s25 }
0x1fa0   : > { %v1597_v4 = vpop.permute.xlu0 %1596 }
0x1fa1   : > { %v1599_v0 = vadd.f32 %v1597_v4, %v1589_v34 }
0x1fa3   : > { %2406 = vtanh.f32 %v1599_v0 }
0x1fb0   : > { %v2407_v35 = vpop.eup %2406 }
0x1fb1   : > { %1602 = vrot.lane.b32.xlu1 %v2407_v35, %s2432_s24 }
0x2023   : > { %v1603_v36 = vpop.permute.xlu1 %1602 }
0x2024   : > { %v1605_v9 = vmul.f32 %v1603_v36, %v1588_v42 }
0x2026   : > { %v2838_v38 = vpack.c.bf16 %v1605_v9, %v1605_v9 }
0x2028   : > { %1615 = vrot.lane.b32.xlu0 %v2838_v38, %s2433_s25 }
0x209a   : > { %v1616_v40 = vpop.permute.xlu0 %1615 }
0x209b   : > { %2312 = vmatmul.mubr.msk.bf16.vlgmr.msra.gmra.mxu1 %vm466_vm6, %v1616_v40 }
0x209c   : > { %2324 = vmatpush3.bf16.msra.mxu1 %v2702_v54  ;;  %2327 = vmatprep.mubr.msk.bf16.mxu1 %vm2429_vm1, %v2428_v1 }
0x209d   : > { %2325 = vmatprep.subr.bf16.mxu1 %v2428_v1 }
0x20a0   : > { %2326 = vmatpush3.bf16.msra.mxu1 %v2710_v14 }
0x215b   : > { %v1654_v43 = vpop.f32.mrf.mxu1 }
0x215c   : > { %v1660_v44 = vadd.f32 %v1654_v43, %v1208_v41 }
0x215d   : > { %v2313_v45 = vpop.f32.mrf.mxu1 }
0x215e   : > { %v1661_v47 = vmul.f32 %v1660_v44, %v2554_v23 }
0x215f   : > { %v1657_v48 = vpop.f32.mrf.mxu1 }
0x2160   : > { %2408 = vtanh.f32 %v1661_v47 }
0x2161   : > { %v2314_v7 = vpop.f32.mrf.mxu1 }
0x216d   : > { %v2409_v49 = vpop.eup %2408 }
0x216e   : > { %1667 = vrot.lane.b32.xlu1 %v2409_v49, %s2432_s24  ;;  %v1663_v54 = vmul.f32 0.5, %v2409_v49 }
0x2170   : > { %v1664_v50 = vadd.f32 0.5, %v1663_v54 }
0x2172   : > { %v1665_v14 = vmul.f32 %v1664_v50, %v1599_v0 }
0x21e0   : > { %v1668_v39 = vpop.permute.xlu1 %1667 }
0x21e1   : > { %v1670_v1 = vmul.f32 %v1668_v39, %v1664_v50 }
0x21e3   : > { %1672 = vrot.lane.b32.xlu0 %v1670_v1, %s2433_s25 }
0x2255   : > { %v1673_v52 = vpop.permute.xlu0 %1672 }
0x2256   : > { %v1675_v31 = vadd.f32 %v1673_v52, %v1665_v14 }
0x2258   : > { %2410 = vtanh.f32 %v1675_v31 }
0x2265   : > { %v2411_v53 = vpop.eup %2410 }
0x2266   : > { %1678 = vrot.lane.b32.xlu1 %v2411_v53, %s2432_s24 }
0x22d8   : > { %v1679_v55 = vpop.permute.xlu1 %1678 }
0x22d9   : > { %v1681_v6 = vmul.f32 %v1679_v55, %v1664_v50 }
0x22db   : > { %v2854_v56 = vpack.c.bf16 %v1681_v6, %v1681_v6 }
0x22dd   : > { %1691 = vrot.lane.b32.xlu0 %v2854_v56, %s2433_s25 }
0x234f   : > { %v1692_v58 = vpop.permute.xlu0 %1691 }
0x2350   : > { %2320 = vmatmul.mubr.msk.bf16.vlgmr.msra.gmra.mxu0 %vm466_vm6, %v1692_v58 }
0x2410   : > { %v1730_v37 = vpop.f32.mrf.mxu0 }
0x2411   : > { %v1736_v33 = vadd.f32 %v1730_v37, %v1213_v59 }
0x2412   : > { %v2321_v60 = vpop.f32.mrf.mxu0 }
0x2413   : > { %v1737_v22 = vmul.f32 %v1736_v33, %v2554_v23 }
0x2414   : > { %v1733_v61 = vpop.f32.mrf.mxu0 }
0x2415   : > { %2412 = vtanh.f32 %v1737_v22 }
0x2416   : > { %v2322_v62 = vpop.f32.mrf.mxu0 }
0x2422   : > { %v2413_v63 = vpop.eup %2412 }
0x2423   : > { %1743 = vrot.lane.b32.xlu1 %v2413_v63, %s2432_s24  ;;  %v1739_v2 = vmul.f32 0.5, %v2413_v63 }
0x2425   : > { %v1740_v57 = vadd.f32 0.5, %v1739_v2 }
0x2427   : > { %v1741_v3 = vmul.f32 %v1740_v57, %v1675_v31 }
0x2495   : > { %v1744_v5 = vpop.permute.xlu1 %1743 }
0x2496   : > { %v1746_v11 = vmul.f32 %v1744_v5, %v1740_v57 }
0x2498   : > { %1748 = vrot.lane.b32.xlu0 %v1746_v11, %s2433_s25 }
0x250a   : > { %v1749_v17 = vpop.permute.xlu0 %1748 }
0x250b   : > { %v1751_v8 = vadd.f32 %v1749_v17, %v1741_v3 }
0x250d   : > { %2414 = vtanh.f32 %v1751_v8 }
0x251a   : > { %v2415_v19 = vpop.eup %2414 }
0x251b   : > { %1754 = vrot.lane.b32.xlu1 %v2415_v19, %s2432_s24 }
0x258d   : > { %v1755_v20 = vpop.permute.xlu1 %1754 }
0x258e   : > { %v1757_v21 = vmul.f32 %v1755_v20, %v1740_v57 }
0x2590   : > { %v1758_v10 = vpack.c.bf16 %v1757_v21, %v1757_v21 }
0x2592   : > { %1767 = vrot.lane.b32.xlu0 %v1758_v10, %s2433_s25 }
0x2604   : > { %v1768_v24 = vpop.permute.xlu0 %1767 }
0x2605   : > { %2328 = vmatmul.mubr.msk.bf16.vlgmr.msra.gmra.mxu1 %vm466_vm6, %v1768_v24 }
0x26c5   : > { %v1806_v28 = vpop.f32.mrf.mxu1 }
0x26c6   : > { %v1812_v29 = vadd.f32 %v1806_v28, %v1216_v26 }
0x26c7   : > { %v2329_v16 = vpop.f32.mrf.mxu1 }
0x26c8   : > { %v1813_v42 = vmul.f32 %v1812_v29, %v2554_v23 }
0x26c9   : > { %v1809_v18 = vpop.f32.mrf.mxu1 }
0x26ca   : > { %2416 = vtanh.f32 %v1813_v42  ;;  %v1924_v42 = vshrl.u32 %v333_v12, 7  ;;  %v1906_v18 = vstv %s1905_s18 }
0x26cb   : > { %v2330_v32 = vpop.f32.mrf.mxu1 }
0x26d7   : > { %v2417_v34 = vpop.eup %2416 }
0x26d8   : > { %1819 = vrot.lane.b32.xlu1 %v2417_v34, %s2432_s24  ;;  %v1815_v4 = vmul.f32 0.5, %v2417_v34 }
0x26da   : > { %v1816_v0 = vadd.f32 0.5, %v1815_v4  ;;  %v1925_v4 = vsub.s32 %v2542_v13, %v1924_v42 }
0x26dc   : > { %v1817_v23 = vmul.f32 %v1816_v0, %v1751_v8 }
0x274a   : > { %v1820_v35 = vpop.permute.xlu1 %1819 }
0x274b   : > { %v1822_v36 = vmul.f32 %v1820_v35, %v1816_v0 }
0x274d   : > { %1824 = vrot.lane.b32.xlu0 %v1822_v36, %s2433_s25 }
0x2751   : > { %1306 = vrot.lane.b32.xlu0 %v2744_v46, %s2433_s25 }
0x2755   : > { %1458 = vrot.lane.b32.xlu0 %v2805_v51, %s2433_s25 }
0x2759   : > { %1610 = vrot.lane.b32.xlu0 %v2838_v38, %s2433_s25 }
0x275d   : > { %1762 = vrot.lane.b32.xlu0 %v1758_v10, %s2433_s25 }
0x27bf   : > { %v1825_v25 = vpop.permute.xlu0 %1824 }
0x27c0   : > { %v1827_v30 = vadd.f32 %v1825_v25, %v1817_v23 }
0x27c2   : > { %2418 = vtanh.f32 %v1827_v30 }
0x27c3   : > { %v1307_v9 = vpop.permute.xlu0 %1306 }
0x27c4   : > { %1309 = vst.msk [vmem:[#allocation3] sm:$0xf] %vm539_vm7, %v1307_v9 }
0x27c7   : > { %v1459_v40 = vpop.permute.xlu0 %1458 }
0x27c8   : > { %1461 = vst.msk [vmem:[#allocation3 + $0x8] sm:$0xf] %vm539_vm7, %v1459_v40 }
0x27cb   : > { %v1611_v41 = vpop.permute.xlu0 %1610 }
0x27cc   : > { %1613 = vst.msk [vmem:[#allocation3 + $0x10] sm:$0xf] %vm539_vm7, %v1611_v41 }
0x27cf   : > { %v2419_v46 = vpop.eup %2418  ;;  %v1763_v51 = vpop.permute.xlu0 %1762 }
0x27d0   : > { %1765 = vst.msk [vmem:[#allocation3 + $0x18] sm:$0xf] %vm539_vm7, %v1763_v51  ;;  %1830 = vrot.lane.b32.xlu1 %v2419_v46, %s2432_s24 }
0x27d4   : > { %1382 = vrot.lane.b32.xlu1 %v2774_v27, %s2433_s25 }
0x27d8   : > { %1534 = vrot.lane.b32.xlu1 %v2822_v15, %s2433_s25  ;;  %v2083_v15 = vld [vmem:[%s2922_s7] ss:$0 sm:$0xff] }
0x27dc   : > { %1686 = vrot.lane.b32.xlu1 %v2854_v56, %s2433_s25 }
0x2842   : > { %v1831_v38 = vpop.permute.xlu1 %1830 }
0x2843   : > { %v1833_v43 = vmul.f32 %v1831_v38, %v1816_v0 }
0x2845   : > { %v2102_v44 = vpack.c.bf16 %v1833_v43, %v1833_v43 }
0x2846   : > { %v1383_v45 = vpop.permute.xlu1 %1382 }
0x2847   : > { %1385 = vst.msk [vmem:[#allocation3 + $0x4] sm:$0xf] %vm539_vm7, %v1383_v45  ;;  %1838 = vrot.lane.b32.xlu1 %v2102_v44, %s2433_s25 }
0x284a   : > { %v1535_v47 = vpop.permute.xlu1 %1534 }
0x284b   : > { %1537 = vst.msk [vmem:[#allocation3 + $0xc] sm:$0xf] %vm539_vm7, %v1535_v47 }
0x284e   : > { %v1687_v48 = vpop.permute.xlu1 %1686  ;;  %v2104_v7 = vld [vmem:[#allocation3] sm:$0xff]  }
0x284f   : > { %1689 = vst.msk [vmem:[#allocation3 + $0x14] sm:$0xf] %vm539_vm7, %v1687_v48  ;;  %v2105_v27 = vunpack.c.l.bf16 %v2104_v7  ;;  %v2106_v60 = vunpack.c.h.bf16 %v2104_v7 }
0x2851   : > { %v1858_v49 = vmax.f32 %v2105_v27, 0.0  ;;  %v1859_v61 = vmax.f32 %v2106_v60, 0.0 }
0x2852   : > { %v2119_v54 = vld [vmem:[#allocation3 + $0x8] sm:$0xff]  }
0x2853   : > { %v1873_v50 = vmul.f32 %v2083_v15, %v1858_v49  ;;  %v2109_v39 = vunpack.c.l.bf16 %v2119_v54  ;;  %v2110_v1 = vunpack.c.h.bf16 %v2119_v54  ;;  %v1874_v63 = vmul.f32 %v2083_v15, %v1859_v61 }
0x2855   : > { %v1881_v14 = vsel %vm466_vm6, %v1873_v50, 0.0  ;;  %v1860_v52 = vmax.f32 %v2109_v39, 0.0  ;;  %v1861_v31 = vmax.f32 %v2110_v1, 0.0  ;;  %v1884_v57 = vsel %vm466_vm6, %v1874_v63, 0.0 }
0x2856   : > { %1882 = vadd.xlane.f32.xlu0 %v1881_v14  ;;  %v2120_v53 = vld [vmem:[#allocation3 + $0x10] sm:$0xff]  }
0x2857   : > { %v1875_v55 = vmul.f32 %v2083_v15, %v1860_v52  ;;  %v2114_v6 = vunpack.c.h.bf16 %v2120_v53  ;;  %v1876_v58 = vmul.f32 %v2083_v15, %v1861_v31  ;;  %v2113_v62 = vunpack.c.l.bf16 %v2120_v53 }
0x2859   : > { %v1887_v56 = vsel %vm466_vm6, %v1875_v55, 0.0  ;;  %v1863_v59 = vmax.f32 %v2114_v6, 0.0  ;;  %v1890_v37 = vsel %vm466_vm6, %v1876_v58, 0.0  ;;  %v1862_v2 = vmax.f32 %v2113_v62, 0.0 }
0x285a   : > { %1888 = vadd.xlane.f32.xlu0 %v1887_v56 }
0x285b   : > { %v1878_v33 = vmul.f32 %v2083_v15, %v1863_v59  ;;  %v1877_v5 = vmul.f32 %v2083_v15, %v1862_v2 }
0x285d   : > { %v1896_v22 = vsel %vm466_vm6, %v1878_v33, 0.0  ;;  %v1893_v11 = vsel %vm466_vm6, %v1877_v5, 0.0 }
0x285e   : > { %1891 = vadd.xlane.f32.xlu0 %v1890_v37 }
0x2862   : > { %1897 = vadd.xlane.f32.xlu0 %v1896_v22 }
0x286b   : > { %1885 = vadd.xlane.f32.xlu1 %v1884_v57 }
0x286f   : > { %1894 = vadd.xlane.f32.xlu1 %v1893_v11 }
0x28b9   : > { %v1839_v3 = vpop.permute.xlu1 %1838 }
0x28ba   : > { %1841 = vst.msk [vmem:[#allocation3 + $0x1c] sm:$0xf] %vm539_vm7, %v1839_v3 }
0x28c1   : > { %v2121_v17 = vld [vmem:[#allocation3 + $0x18] sm:$0xff]  }
0x28c2   : > { %v2118_v8 = vunpack.c.h.bf16 %v2121_v17  ;;  %v2117_v19 = vunpack.c.l.bf16 %v2121_v17 }
0x28c4   : > { %v1865_v20 = vmax.f32 %v2118_v8, 0.0  ;;  %v1864_v21 = vmax.f32 %v2117_v19, 0.0 }
0x28c6   : > { %v1880_v10 = vmul.f32 %v2083_v15, %v1865_v20  ;;  %v1879_v24 = vmul.f32 %v2083_v15, %v1864_v21 }
0x28c8   : > { %v1902_v26 = vsel %vm466_vm6, %v1880_v10, 0.0  ;;  %v1899_v28 = vsel %vm466_vm6, %v1879_v24, 0.0 }
0x28c9   : > { %1903 = vadd.xlane.f32.xlu0 %v1902_v26  ;;  %1900 = vadd.xlane.f32.xlu1 %v1899_v28 }
0x28df   : > { %v1883_v29 = vpop.xlane.xlu0 %1882 }
0x28e0   : > { %v1907_v0 = vadd.f32 %v1906_v18, %v1883_v29 }
0x28e2   : > { %v1926_v25 = vrot.slane %v1907_v0, %v1925_v4 }
0x28e3   : > { %v1889_v32 = vpop.xlane.xlu0 %1888 }
0x28e4   : > { %v1909_v36 = vadd.f32 %v1906_v18, %v1889_v32 }
0x28e6   : > { %v1934_v41 = vrot.slane %v1909_v36, %v1925_v4 }
0x28e7   : > { %v1892_v23 = vpop.xlane.xlu0 %1891 }
0x28e8   : > { %v1910_v9 = vadd.f32 %v1906_v18, %v1892_v23 }
0x28ea   : > { %v1938_v38 = vrot.slane %v1910_v9, %v1925_v4 }
0x28eb   : > { %v1898_v51 = vpop.xlane.xlu0 %1897 }
0x28ec   : > { %v1912_v44 = vadd.f32 %v1906_v18, %v1898_v51 }
0x28ee   : > { %v1946_v15 = vrot.slane %v1912_v44, %v1925_v4 }
0x28f4   : > { %v1886_v16 = vpop.xlane.xlu1 %1885 }
0x28f5   : > { %v1908_v34 = vadd.f32 %v1906_v18, %v1886_v16 }
0x28f7   : > { %v1930_v35 = vrot.slane %v1908_v34, %v1925_v4 }
0x28f8   : > { %v1895_v30 = vpop.xlane.xlu1 %1894 }
0x28f9   : > { %v1956_v40 = vsel %vm1955_vm8, %v1930_v35, %v1926_v25  ;;  %v1911_v46 = vadd.f32 %v1906_v18, %v1895_v30 }
0x28fa   : > { %v1958_v12 = vsel %vm1957_vm9, %v1934_v41, %v1956_v40 }
0x28fb   : > { %v1942_v43 = vrot.slane %v1911_v46, %v1925_v4  ;;  %v1960_v13 = vsel %vm1959_vm10, %v1938_v38, %v1958_v12 }
0x28fd   : > { %v1962_v48 = vsel %vm1961_vm11, %v1942_v43, %v1960_v13 }
0x28fe   : > { %v1964_v50 = vsel %vm1963_vm12, %v1946_v15, %v1962_v48 }
0x2952   : > { %v1904_v45 = vpop.xlane.xlu0 %1903  ;;  %v1901_v47 = vpop.xlane.xlu1 %1900 }
0x2953   : > { %v1914_v7 = vadd.f32 %v1906_v18, %v1904_v45  ;;  %v1913_v27 = vadd.f32 %v1906_v18, %v1901_v47 }
0x2955   : > { %v1954_v49 = vrot.slane %v1914_v7, %v1925_v4  ;;  %v1950_v54 = vrot.slane %v1913_v27, %v1925_v4 }
0x2957   : > { %v1966_v39 = vsel %vm1965_vm13, %v1950_v54, %v1964_v50 }
0x2958   : > { %v1968_v1 = vsel %vm1967_vm14, %v1954_v49, %v1966_v39 }
0x2959   : > { %1971 = vst.msk [vmem:[%s331_s22] sm:$0xff] %vm1970_vm15, %v1968_v1 }
0x295a PF: > { %s20_s11 = sadd.s32 1, %s2426_s11  }
0x295b   : > { %p17_p4 = scmp.ge.s32.totalorder %s20_s11, 4  }
0x295d   :  { %19 = sbr.rel (!%p17_p4) target bundleno = 2 (0x2), region = 100 }

</bundles_post_ra>
